<compile_context>
chip_gen: v5e
topology: v5e:2x2
jax: 0.10.0
libtpu: 0.0.40
codegen_flags: <defaults>
</compile_context>

<pallas_src>
import functools
import math

import jax
import jax.numpy as jnp
from jax.experimental import pallas as pl
from jax.experimental.pallas import tpu as pltpu


_VMEM_LIMIT = 48 * 1024 * 1024        # safe on v5e/v6e (128 MiB) and v7x (64 MiB)
_FUSED_MAX_NODES = 512                # single-tile fused path threshold (padded)
_H_RESIDENT_MAX_BYTES = 12 * 1024 * 1024   # keep h fully resident in pass 2 if <= this


def _round_up(x, m):
    return ((x + m - 1) // m) * m


def node_padding(n):
    """Padded node count used by the kernels (callers can pre-pad adj to this)."""
    return _round_up(n, 128) if _round_up(n, 128) <= _FUSED_MAX_NODES else _round_up(n, 512)


def pad_adj(adj, n_p=None):
    """Pad + cast the adjacency once; cache/reuse across layers and steps.

    Padded rows/cols MUST be exactly zero: padded rows of h carry a nonzero
    time column (sigmoid(0)*exp(scale)+1.1) and must not be aggregated.
    """
    n = adj.shape[0]
    if n_p is None:
        n_p = node_padding(n)
    # TODO(synk): per-generation adj compression (fp8-e4m3 on v7x, int8+per-row
    # scale on v5e/v6e) to halve the dominant HBM traffic of the aggregation.
    return jnp.zeros((n_p, n_p), jnp.bfloat16).at[:n, :n].set(adj.astype(jnp.bfloat16))


# ----------------------------------------------------------------------------
# In-kernel math helpers (f32 tiles; padded feature lanes are exact zeros).
# ----------------------------------------------------------------------------
def _hyperboloid_project(xw, scale_exp):
    """LorentzLinear epilogue on an f32 tile of xw."""
    col0 = jax.lax.broadcasted_iota(jnp.int32, xw.shape, 1) == 0
    x0 = xw[:, 0:1]                                       # lane-0 slice
    time = jax.nn.sigmoid(x0) * scale_exp + 1.1           # (tm, 1)
    total = jnp.sum(xw * xw, axis=-1, keepdims=True)      # single cross-lane reduce
    sq = jnp.maximum(total - x0 * x0, 1e-8)               # sum over narrow lanes
    s = (time * time - 1.0) / sq
    return jnp.where(col0, time, xw * jnp.sqrt(s))


def _lorentz_normalize(support):
    """support / sqrt(clamp_min(|<support,support>_L|, 1e-8))."""
    sq = support * support
    col0 = jax.lax.broadcasted_iota(jnp.int32, sq.shape, 1) == 0
    inner = jnp.sum(jnp.where(col0, -sq, sq), axis=-1, keepdims=True)
    return support * jax.lax.rsqrt(jnp.maximum(jnp.abs(inner), 1e-8))


# ----------------------------------------------------------------------------
# Kernels
# ----------------------------------------------------------------------------
def _fused_kernel(x_ref, wt_ref, b_ref, scale_ref, adj_ref, out_ref):
    """Small-graph path: linear + projection + aggregation + normalize, one tile.

    x_ref   : (n_p, f_in_p)    VMEM bf16
    wt_ref  : (f_in_p, f_out_p) VMEM bf16 (pre-transposed weight)
    b_ref   : (1, f_out_p)     VMEM f32
    scale_ref: (1,)            SMEM f32 (exp(scale), precomputed)
    adj_ref : (n_p, n_p)       VMEM bf16
    out_ref : (n_p, f_out_p)   VMEM f32
    """
    xw = jnp.dot(x_ref[...], wt_ref[...],
                 preferred_element_type=jnp.float32) + b_ref[...]
    h = _hyperboloid_project(xw, scale_ref[0]).astype(jnp.bfloat16)
    support = jnp.dot(adj_ref[...], h, preferred_element_type=jnp.float32)
    out_ref[...] = _lorentz_normalize(support).astype(out_ref.dtype)


def _lorentz_linear_kernel(x_ref, wt_ref, b_ref, scale_ref, h_ref):
    """Pass 1: LorentzLinear + hyperboloid projection for one row tile."""
    xw = jnp.dot(x_ref[...], wt_ref[...],
                 preferred_element_type=jnp.float32) + b_ref[...]
    h_ref[...] = _hyperboloid_project(xw, scale_ref[0]).astype(h_ref.dtype)


def _lorentz_agg_kernel(adj_ref, h_ref, out_ref, *, tile_k, h_resident):
    """Pass 2: tiled adj @ h + Lorentz normalization; accumulate into out_ref.

    adj_ref : (tile_m, tile_k)   VMEM bf16
    h_ref   : (n_p, f_out_p) bf16 if h_resident else (tile_k, f_out_p) bf16
    out_ref : (tile_m, f_out_p)  VMEM f32 (resident across the k axis)
    """
    k = pl.program_id(1)

    @pl.when(k == 0)
    def _init():
        out_ref[...] = jnp.zeros_like(out_ref)

    if h_resident:
        start = pl.multiple_of(k * tile_k, tile_k)
        h_blk = h_ref[pl.ds(start, tile_k), :]
    else:
        h_blk = h_ref[...]

    out_ref[...] += jnp.dot(adj_ref[...], h_blk,
                            preferred_element_type=jnp.float32)

    @pl.when(k == pl.num_programs(1) - 1)
    def _finalize():
        out_ref[...] = _lorentz_normalize(out_ref[...]).astype(out_ref.dtype)


# ----------------------------------------------------------------------------
# Wrapper
# ----------------------------------------------------------------------------
def lorentz_graph_convolution(x, adj, weight, bias, scale_log, *, adj_padded=None):
    """Returns (h, adj) like the PyTorch module's forward (use_att=False)."""
    N, f_in = x.shape
    f_out = weight.shape[0]

    # Lane-dense feature padding; node padding chosen by the tile plan.
    f_in_p = _round_up(f_in, 128)
    f_out_p = _round_up(f_out, 128)
    n_p = node_padding(N)

    if adj_padded is None:
        adj_padded = pad_adj(adj, n_p)
    assert adj_padded.shape == (n_p, n_p) and adj_padded.dtype == jnp.bfloat16, (
        "pre-padded adj must be bf16 (n_p, n_p) with exactly-zero padding")

    # bf16 MXU operands; zero-padded W rows/cols + zero bias keep padded lanes
    # exactly 0, so the reductions and the adj matmul need no extra masking.
    x_p = jnp.zeros((n_p, f_in_p), jnp.bfloat16).at[:N, :f_in].set(
        x.astype(jnp.bfloat16))
    wt_p = jnp.zeros((f_in_p, f_out_p), jnp.bfloat16).at[:f_in, :f_out].set(
        weight.T.astype(jnp.bfloat16))
    b_p = jnp.zeros((1, f_out_p), jnp.float32).at[0, :f_out].set(
        bias.astype(jnp.float32))
    scale_exp = jnp.exp(jnp.asarray([scale_log], dtype=jnp.float32))  # host-side

    # ----------------- small graphs: single fused kernel -----------------
    if n_p <= _FUSED_MAX_NODES:
        cost = pl.CostEstimate(
            flops=2 * n_p * f_in_p * f_out_p + 2 * n_p * n_p * f_out_p
                  + 16 * n_p * f_out_p,
            transcendentals=3 * n_p,
            bytes_accessed=2 * (n_p * f_in_p + f_in_p * f_out_p + n_p * n_p)
                           + 4 * (n_p * f_out_p + f_out_p),
        )
        out = pl.pallas_call(
            _fused_kernel,
            out_shape=jax.ShapeDtypeStruct((n_p, f_out_p), jnp.float32),
            grid=(1,),
            in_specs=[
                pl.BlockSpec((n_p, f_in_p), lambda i: (0, 0)),
                pl.BlockSpec((f_in_p, f_out_p), lambda i: (0, 0)),
                pl.BlockSpec((1, f_out_p), lambda i: (0, 0)),
                pl.BlockSpec(memory_space=pltpu.SMEM),
                pl.BlockSpec((n_p, n_p), lambda i: (0, 0)),
            ],
            out_specs=pl.BlockSpec((n_p, f_out_p), lambda i: (0, 0)),
            compiler_params=pltpu.CompilerParams(
                dimension_semantics=("arbitrary",),
                vmem_limit_bytes=_VMEM_LIMIT),
            cost_estimate=cost,
        )(x_p, wt_p, b_p, scale_exp, adj_padded)
        return out[:N, :f_out], adj

    # ----------------- large graphs: two-pass tiled path -----------------
    tile_lin = 512
    tile_m = 512
    # Bigger reduction tiles once the problem is big enough to amortize them.
    tile_k = 1024 if (n_p % 1024 == 0 and n_p > 1024) else 512

    # Pass 1: LorentzLinear + hyperboloid projection (bf16 MXU, f32 epilogue).
    # TODO(synk): for very large feature dims, tile the (f_in_p, f_out_p) weight
    # block (f_out grid axis + f_in reduction axis) instead of keeping it resident.
    lin_cost = pl.CostEstimate(
        flops=2 * n_p * f_in_p * f_out_p + 12 * n_p * f_out_p,
        transcendentals=3 * n_p,
        bytes_accessed=2 * (n_p * f_in_p + f_in_p * f_out_p + n_p * f_out_p)
                       + 4 * f_out_p,
    )
    h = pl.pallas_call(
        _lorentz_linear_kernel,
        out_shape=jax.ShapeDtypeStruct((n_p, f_out_p), jnp.bfloat16),
        grid=(n_p // tile_lin,),
        in_specs=[
            pl.BlockSpec((tile_lin, f_in_p), lambda i: (i, 0)),
            pl.BlockSpec((f_in_p, f_out_p), lambda i: (0, 0)),
            pl.BlockSpec((1, f_out_p), lambda i: (0, 0)),
            pl.BlockSpec(memory_space=pltpu.SMEM),
        ],
        out_specs=pl.BlockSpec((tile_lin, f_out_p), lambda i: (i, 0)),
        compiler_params=pltpu.CompilerParams(
            dimension_semantics=("parallel",),
            vmem_limit_bytes=_VMEM_LIMIT),
        cost_estimate=lin_cost,
    )(x_p, wt_p, b_p, scale_exp)

    # Pass 2: adj @ h + normalization. Keep h fully resident when it fits so it
    # is DMA'd once instead of once per row tile; accumulate into out block.
    h_bytes = n_p * f_out_p * 2
    h_resident = h_bytes <= _H_RESIDENT_MAX_BYTES
    if h_resident:
        h_spec = pl.BlockSpec((n_p, f_out_p), lambda i, k: (0, 0))
        h_traffic = h_bytes
    else:
        h_spec = pl.BlockSpec((tile_k, f_out_p), lambda i, k: (k, 0))
        h_traffic = h_bytes * (n_p // tile_m)

    agg_kernel = functools.partial(_lorentz_agg_kernel,
                                   tile_k=tile_k, h_resident=h_resident)
    agg_cost = pl.CostEstimate(
        flops=2 * n_p * n_p * f_out_p + 8 * n_p * f_out_p,
        transcendentals=n_p,
        bytes_accessed=2 * n_p * n_p + h_traffic + 4 * n_p * f_out_p,
    )
    out = pl.pallas_call(
        agg_kernel,
        out_shape=jax.ShapeDtypeStruct((n_p, f_out_p), jnp.float32),
        grid=(n_p // tile_m, n_p // tile_k),          # reduction axis last
        in_specs=[
            pl.BlockSpec((tile_m, tile_k), lambda i, k: (i, k)),
            h_spec,
        ],
        out_specs=pl.BlockSpec((tile_m, f_out_p), lambda i, k: (i, 0)),
        compiler_params=pltpu.CompilerParams(
            dimension_semantics=("parallel", "arbitrary"),
            vmem_limit_bytes=_VMEM_LIMIT),
        cost_estimate=agg_cost,
    )(adj_padded, h)

    return out[:N, :f_out], adj


# ----------------------------------------------------------------------------
# Parameter init (mirrors LorentzLinear.reset_parameters) and a JAX reference.
# ----------------------------------------------------------------------------
def init_params(key, in_features, out_features):
    stdv = 1.0 / math.sqrt(out_features)
    w = jax.random.uniform(key, (out_features, in_features),
                           minval=-stdv, maxval=stdv, dtype=jnp.float32)
    # for idx in range(0, in_features, in_features): weight[:, idx] = 0 -> col 0
    w = w.at[:, 0].set(0.0)
    b = jnp.zeros((out_features,), dtype=jnp.float32)
    scale_log = math.log(10.0)                  # nn.Parameter(ones(()) * log(10))
    return w, b, scale_log


def _reference(x, adj, weight, bias, scale_log):
    """Pure-JAX f32 reference of the PyTorch forward (for correctness check)."""
    xw = x @ weight.T + bias
    time = jax.nn.sigmoid(xw[:, :1]) * jnp.exp(scale_log) + 1.1
    narrow = xw[:, 1:]
    sq = jnp.maximum(jnp.sum(narrow * narrow, axis=-1, keepdims=True), 1e-8)
    s = (time * time - 1.0) / sq
    h = jnp.concatenate([time, narrow * jnp.sqrt(s)], axis=-1)
    support = adj @ h
    inner = (-support[:, :1] ** 2
             + jnp.sum(support[:, 1:] ** 2, axis=-1, keepdims=True))
    denom = jnp.sqrt(jnp.maximum(jnp.abs(inner), 1e-8))
    return support / denom


def _make_adj(key, n):
    """Deterministic dense adjacency: symmetric, self-loops, row-normalized."""
    a = (jax.random.uniform(key, (n, n)) > 0.9).astype(jnp.float32)
    a = jnp.maximum(a, a.T) + jnp.eye(n, dtype=jnp.float32)
    return a / jnp.sum(a, axis=-1, keepdims=True)


if __name__ == "__main__":
    # TODO(synk): use_att=True / local_agg=True attention path (manifold.cinner)
    # not implemented; this kernel covers the default use_att=False aggregation.
    key = jax.random.PRNGKey(0)
    k1, k2, k3, k4, k5, k6 = jax.random.split(key, 6)

    # --- test 1: small graph -> fused single-tile kernel ---
    N, IN_F, OUT_F = 16, 32, 32
    x = jax.random.normal(k1, (N, IN_F), dtype=jnp.float32)
    adj = _make_adj(k2, N)
    weight, bias, scale_log = init_params(k3, IN_F, OUT_F)

    adj_p = pad_adj(adj)                      # hoisted pad+cast (reusable)
    h_out, adj_out = lorentz_graph_convolution(
        x, adj, weight, bias, scale_log, adj_padded=adj_p)
    jax.block_until_ready(h_out)
    assert h_out.shape == (N, OUT_F) and h_out.dtype == jnp.float32
    assert bool(jnp.all(jnp.isfinite(h_out)))
    ref = _reference(x, adj, weight, bias, scale_log)
    assert bool(jnp.allclose(h_out, ref, rtol=5e-2, atol=5e-2)), "fused path mismatch"

    # --- test 2: larger graph -> two-pass tiled path (resident h, k-accumulate) ---
    N2, IN_F2, OUT_F2 = 700, 32, 48
    x2 = jax.random.normal(k4, (N2, IN_F2), dtype=jnp.float32)
    adj2 = _make_adj(k5, N2)
    weight2, bias2, scale_log2 = init_params(k6, IN_F2, OUT_F2)

    adj2_p = pad_adj(adj2)
    h2_out, _ = lorentz_graph_convolution(
        x2, adj2, weight2, bias2, scale_log2, adj_padded=adj2_p)
    jax.block_until_ready(h2_out)
    assert h2_out.shape == (N2, OUT_F2) and h2_out.dtype == jnp.float32
    assert bool(jnp.all(jnp.isfinite(h2_out)))
    ref2 = _reference(x2, adj2, weight2, bias2, scale_log2)
    assert bool(jnp.allclose(h2_out, ref2, rtol=5e-2, atol=5e-2)), "tiled path mismatch"

    print("KERNEL_OK")
</pallas_src>

<mosaic_0001>
module attributes {stable_mosaic.version = 11 : i64} {
  func.func @_fused_kernel(%arg0: i32, %arg1: memref<128x128xbf16, #tpu.memory_space<vmem>>, %arg2: memref<128x128xbf16, #tpu.memory_space<vmem>>, %arg3: memref<1x128xf32, #tpu.memory_space<vmem>>, %arg4: memref<1xf32, #tpu.memory_space<smem>>, %arg5: memref<128x128xbf16, #tpu.memory_space<vmem>>, %arg6: memref<128x128xf32, #tpu.memory_space<vmem>>) attributes {dimension_semantics = [#tpu.dimension_semantics<arbitrary>], iteration_bounds = array<i64: 1>, scalar_prefetch = 0 : i64, scratch_operands = 0 : i64, tpu.core_type = #tpu.core_type<tc>, window_params = [{pipeline_mode = #tpu.pipeline_mode<synchronous>, transform_indices = @transform_0, window_bounds = array<i64: 128, 128>}, {pipeline_mode = #tpu.pipeline_mode<synchronous>, transform_indices = @transform_1, window_bounds = array<i64: 128, 128>}, {pipeline_mode = #tpu.pipeline_mode<synchronous>, transform_indices = @transform_2, window_bounds = array<i64: 1, 128>}, {transform_indices = @transform_3, window_bounds = array<i64: 1>}, {pipeline_mode = #tpu.pipeline_mode<synchronous>, transform_indices = @transform_4, window_bounds = array<i64: 128, 128>}, {pipeline_mode = #tpu.pipeline_mode<synchronous>, transform_indices = @transform_5, window_bounds = array<i64: 128, 128>}]} {
    %c0 = arith.constant 0 : index
    %c0_0 = arith.constant 0 : index
    %0 = vector.load %arg1[%c0, %c0_0] : memref<128x128xbf16, #tpu.memory_space<vmem>>, vector<128x128xbf16>
    %c0_1 = arith.constant 0 : index
    %c0_2 = arith.constant 0 : index
    %1 = vector.load %arg2[%c0_1, %c0_2] : memref<128x128xbf16, #tpu.memory_space<vmem>>, vector<128x128xbf16>
    %cst = arith.constant dense<0.000000e+00> : vector<128x128xf32>
    %2 = tpu.matmul %0, %1, %cst {dimension_numbers = #tpu.dot_dimension_numbers<[1], [0], [0], [1], [0, 0, 1, 1], [], []>} : vector<128x128xbf16>, vector<128x128xbf16>, vector<128x128xf32> -> vector<128x128xf32>
    %c0_3 = arith.constant 0 : index
    %c0_4 = arith.constant 0 : index
    %3 = vector.load %arg3[%c0_3, %c0_4] : memref<1x128xf32, #tpu.memory_space<vmem>>, vector<1x128xf32>
    %4 = vector.broadcast %3 : vector<1x128xf32> to vector<128x128xf32>
    %5 = arith.addf %2, %4 : vector<128x128xf32>
    %c0_5 = arith.constant 0 : index
    %6 = memref.load %arg4[%c0_5] : memref<1xf32, #tpu.memory_space<smem>>
    %7 = tpu.iota {dimensions = array<i32: 1>} : vector<128x128xi32>
    %c0_i32 = arith.constant 0 : i32
    %8 = vector.broadcast %c0_i32 : i32 to vector<128x128xi32>
    %9 = arith.cmpi eq, %7, %8 : vector<128x128xi32>
    %10 = vector.extract_strided_slice %5 {offsets = [0, 0], sizes = [128, 1], strides = [1, 1]} : vector<128x128xf32> to vector<128x1xf32>
    %11 = arith.negf %10 : vector<128x1xf32>
    %12 = math.exp %11 : vector<128x1xf32>
    %cst_6 = arith.constant 1.000000e+00 : f32
    %13 = vector.broadcast %cst_6 : f32 to vector<128x1xf32>
    %14 = arith.addf %13, %12 : vector<128x1xf32>
    %15 = arith.divf %13, %14 : vector<128x1xf32>
    %16 = vector.broadcast %6 : f32 to vector<128x1xf32>
    %17 = arith.mulf %15, %16 : vector<128x1xf32>
    %cst_7 = arith.constant 1.100000e+00 : f32
    %18 = vector.broadcast %cst_7 : f32 to vector<128x1xf32>
    %19 = arith.addf %17, %18 : vector<128x1xf32>
    %20 = arith.mulf %5, %5 : vector<128x128xf32>
    %cst_8 = arith.constant dense<0.000000e+00> : vector<128xf32>
    %21 = vector.multi_reduction <add>, %20, %cst_8 [1] : vector<128x128xf32> to vector<128xf32>
    %22 = vector.shape_cast %21 : vector<128xf32> to vector<128x1xf32>
    %23 = arith.mulf %10, %10 : vector<128x1xf32>
    %24 = arith.subf %22, %23 : vector<128x1xf32>
    %cst_9 = arith.constant 9.99999993E-9 : f32
    %25 = vector.broadcast %cst_9 : f32 to vector<128x1xf32>
    %26 = arith.maximumf %24, %25 : vector<128x1xf32>
    %27 = arith.mulf %19, %19 : vector<128x1xf32>
    %cst_10 = arith.constant 1.000000e+00 : f32
    %28 = vector.broadcast %cst_10 : f32 to vector<128x1xf32>
    %29 = arith.subf %27, %28 : vector<128x1xf32>
    %30 = arith.divf %29, %26 : vector<128x1xf32>
    %31 = math.sqrt %30 : vector<128x1xf32>
    %32 = vector.broadcast %31 : vector<128x1xf32> to vector<128x128xf32>
    %33 = arith.mulf %5, %32 : vector<128x128xf32>
    %34 = vector.shape_cast %19 : vector<128x1xf32> to vector<128x1xf32>
    %35 = vector.broadcast %34 : vector<128x1xf32> to vector<128x128xf32>
    %36 = arith.select %9, %35, %33 : vector<128x128xi1>, vector<128x128xf32>
    %37 = arith.truncf %36 : vector<128x128xf32> to vector<128x128xbf16>
    %c0_11 = arith.constant 0 : index
    %c0_12 = arith.constant 0 : index
    %38 = vector.load %arg5[%c0_11, %c0_12] : memref<128x128xbf16, #tpu.memory_space<vmem>>, vector<128x128xbf16>
    %cst_13 = arith.constant dense<0.000000e+00> : vector<128x128xf32>
    %39 = tpu.matmul %38, %37, %cst_13 {dimension_numbers = #tpu.dot_dimension_numbers<[1], [0], [0], [1], [0, 0, 1, 1], [], []>} : vector<128x128xbf16>, vector<128x128xbf16>, vector<128x128xf32> -> vector<128x128xf32>
    %40 = arith.mulf %39, %39 : vector<128x128xf32>
    %41 = tpu.iota {dimensions = array<i32: 1>} : vector<128x128xi32>
    %c0_i32_14 = arith.constant 0 : i32
    %42 = vector.broadcast %c0_i32_14 : i32 to vector<128x128xi32>
    %43 = arith.cmpi eq, %41, %42 : vector<128x128xi32>
    %cst_15 = arith.constant 0.000000e+00 : f32
    %44 = vector.broadcast %cst_15 : f32 to vector<128x128xf32>
    %45 = arith.subf %44, %40 : vector<128x128xf32>
    %46 = arith.select %43, %45, %40 : vector<128x128xi1>, vector<128x128xf32>
    %cst_16 = arith.constant dense<0.000000e+00> : vector<128xf32>
    %47 = vector.multi_reduction <add>, %46, %cst_16 [1] : vector<128x128xf32> to vector<128xf32>
    %48 = vector.shape_cast %47 : vector<128xf32> to vector<128x1xf32>
    %49 = math.absf %48 : vector<128x1xf32>
    %cst_17 = arith.constant 9.99999993E-9 : f32
    %50 = vector.broadcast %cst_17 : f32 to vector<128x1xf32>
    %51 = arith.maximumf %49, %50 : vector<128x1xf32>
    %52 = math.rsqrt %51 : vector<128x1xf32>
    %53 = vector.broadcast %52 : vector<128x1xf32> to vector<128x128xf32>
    %54 = arith.mulf %39, %53 : vector<128x128xf32>
    %c0_18 = arith.constant 0 : index
    %c0_19 = arith.constant 0 : index
    %55 = vector.load %arg6[%c0_18, %c0_19] : memref<128x128xf32, #tpu.memory_space<vmem>>, vector<128x128xf32>
    tpu.vector_store %arg6[%c0_18, %c0_19], %54 {strides = array<i32>} : memref<128x128xf32, #tpu.memory_space<vmem>>, vector<128x128xf32>,
    return
  }
  func.func @transform_0(%arg0: i32) -> (i32, i32) {
    %c0_i32 = arith.constant 0 : i32
    %c0_i32_0 = arith.constant 0 : i32
    %c0_i32_1 = arith.constant 0 : i32
    return %c0_i32, %c0_i32_0 : i32, i32
  }
  func.func @transform_1(%arg0: i32) -> (i32, i32) {
    %c0_i32 = arith.constant 0 : i32
    %c0_i32_0 = arith.constant 0 : i32
    %c0_i32_1 = arith.constant 0 : i32
    return %c0_i32, %c0_i32_0 : i32, i32
  }
  func.func @transform_2(%arg0: i32) -> (i32, i32) {
    %c0_i32 = arith.constant 0 : i32
    %c0_i32_0 = arith.constant 0 : i32
    %c0_i32_1 = arith.constant 0 : i32
    return %c0_i32, %c0_i32_0 : i32, i32
  }
  func.func @transform_3(%arg0: i32) -> i32 {
    %c0_i32 = arith.constant 0 : i32
    %c0_i32_0 = arith.constant 0 : i32
    return %c0_i32 : i32
  }
  func.func @transform_4(%arg0: i32) -> (i32, i32) {
    %c0_i32 = arith.constant 0 : i32
    %c0_i32_0 = arith.constant 0 : i32
    %c0_i32_1 = arith.constant 0 : i32
    return %c0_i32, %c0_i32_0 : i32, i32
  }
  func.func @transform_5(%arg0: i32) -> (i32, i32) {
    %c0_i32 = arith.constant 0 : i32
    %c0_i32_0 = arith.constant 0 : i32
    %c0_i32_1 = arith.constant 0 : i32
    return %c0_i32, %c0_i32_0 : i32, i32
  }
}

</mosaic_0001>

<bundles_post_ra>
// kernel: tpu_custom_call.1
= control target key start
LH: loop header
LB: loop body
LE: loop exit
PB: predicated region body
PF: predicated region fallthrough
CT: control target
= control target key end

     0   :  { %11 = vsyncpa [#allocation4], 0  ;;  %s3816_s0 = inlined_call_operand.hbm [shape: bf16[128,128], index: 0, kind: input, shape index: {}]   ;;  %s3817_s1 = inlined_call_operand.hbm [shape: bf16[128,128], index: 1, kind: input, shape index: {}]   ;;  %s3818_s2 = inlined_call_operand.vmem [shape: f32[1,128], index: 2, kind: input, shape index: {}]   ;;  %s3819_s3 = inlined_call_operand.<no memory space> [shape: f32[1], index: 3, kind: input, shape index: {}]   ;;  %s3820_s4 = inlined_call_operand.hbm [shape: bf16[128,128], index: 4, kind: input, shape index: {}]   ;;  %s3821_s5 = inlined_call_operand.hbm [shape: f32[128,128], index: 5, kind: output, shape index: {}]  }
   0x1   :  { %12 = vsyncpa [#allocation7], 0 }
   0x2   :  { %13 = vsyncpa [#allocation5], 0  ;;  %s31_s20 = sshll.u32 %s3817_s1, 4  ;;  %s2255_s21 = smov [#allocation6]   ;;  %s32_s20 = int_to_ptr.hbm [resolvable:$true] %s31_s20 }
   0x3   :  { %s33_s22 = sshll.u32 %s2255_s21, 4  ;;  %s18_s25 = sshll.u32 %s3816_s0, 4  ;;  %s34_s22 = int_to_ptr.vmem [resolvable:$true] %s33_s22  ;;  %s19_s25 = int_to_ptr.hbm [resolvable:$true] %s18_s25 }
   0x4   :  { %s2256_s26 = smov 64   ;;  %s2257_s27 = smov 4  }
   0x5   :  { %39 = dma.hbm_to_vmem [thread:$0]  %s32_s20, 1024, %s34_s22, [#allocation7], %s2256_s26, %s2256_s26, %s2257_s27  }
   0x6   :  { %s2258_s28 = smov [#allocation3]   ;;  %s48_s7 = sshll.u32 %s3820_s4, 4  ;;  %s49_s7 = int_to_ptr.hbm [resolvable:$true] %s48_s7 }
   0x7   :  { %s20_s29 = sshll.u32 %s2258_s28, 4  ;;  %s2259_s1 = smov [#allocation8]   ;;  %s21_s29 = int_to_ptr.vmem [resolvable:$true] %s20_s29 }
   0x8   :  { %26 = dma.hbm_to_vmem [thread:$0]  %s19_s25, 1024, %s21_s29, [#allocation4], %s2256_s26, %s2256_s26, %s2257_s27  }
   0x9   :  { %s50_s8 = sshll.u32 %s2259_s1, 4  ;;  %s51_s8 = int_to_ptr.vmem [resolvable:$true] %s50_s8 }
   0xa   :  { %56 = dma.hbm_to_vmem [thread:$0]  %s49_s7, 1024, %s51_s8, [#allocation7], %s2256_s26, %s2256_s26, %s2257_s27  }
   0xb   :  { %2249 = dma.done.wait [#allocation4], 1024  }
   0xc   :  { %2250 = vsyncadd [#allocation4], 4294966272 }
   0xd   :  { %2251 = dma.done.wait [#allocation7], 2048  }
   0xe   :  { %2252 = vsyncadd [#allocation7], 4294965248  ;;  %v1915_v0 = vld [vmem:[#allocation6 + $0x38] sm:$0xff]  ;;  %v1914_v1 = vld [vmem:[#allocation6 + $0x30] sm:$0xff]  ;;  %s1758_s13 = sshll.u32 %s3821_s5, 4  ;;  %s2262_s14 = smov 128   ;;  %s1759_s13 = int_to_ptr.hbm [resolvable:$true] %s1758_s13 }
   0xf   :  { %201 = vmatpush.bf16.msra.mxu0 %v1915_v0  ;;  %1924 = vmatpush.bf16.msra.mxu2 %v1915_v0  ;;  %v1913_v2 = vld [vmem:[#allocation6 + $0x28] sm:$0xff]  ;;  %v1912_v3 = vld [vmem:[#allocation6 + $0x20] sm:$0xff]  ;;  %v1911_v4 = vld [vmem:[#allocation6 + $0x18] sm:$0xff]  ;;  %s2263_s15 = smov 8  }
  0x10   :  { %v1910_v5 = vld [vmem:[#allocation6 + $0x10] sm:$0xff]  ;;  %v1909_v6 = vld [vmem:[#allocation6 + $0x8] sm:$0xff]  ;;  %v1908_v7 = vld [vmem:[#allocation6] sm:$0xff] }
  0x11   :  { %v1900_v8 = vld [vmem:[#allocation3] sm:$0xff]  ;;  %v1901_v10 = vld [vmem:[#allocation3 + $0x8] sm:$0xff]  ;;  %v1902_v12 = vld [vmem:[#allocation3 + $0x10] sm:$0xff] }
  0x12   :  { %v1904_v9 = vld [vmem:[#allocation3 + $0x20] sm:$0xff]  ;;  %v1905_v11 = vld [vmem:[#allocation3 + $0x28] sm:$0xff]  ;;  %v1906_v13 = vld [vmem:[#allocation3 + $0x30] sm:$0xff] }
  0x13   :  { %202 = vmatpush.bf16.msra.mxu0 %v1914_v1  ;;  %1925 = vmatpush.bf16.msra.mxu2 %v1914_v1  ;;  %v1903_v14 = vld [vmem:[#allocation3 + $0x18] sm:$0xff]  ;;  %v2308_v18 = vld [vmem:[%s3818_s2] ss:$0 sm:$0xff] }
  0x14   :  { %v1907_v15 = vld [vmem:[#allocation3 + $0x38] sm:$0xff] }
  0x17   :  { %203 = vmatpush.bf16.msra.mxu0 %v1913_v2  ;;  %1926 = vmatpush.bf16.msra.mxu2 %v1913_v2 }
  0x1b   :  { %204 = vmatpush.bf16.msra.mxu0 %v1912_v3  ;;  %1927 = vmatpush.bf16.msra.mxu2 %v1912_v3 }
  0x1f   :  { %205 = vmatpush.bf16.msra.mxu0 %v1911_v4  ;;  %1928 = vmatpush.bf16.msra.mxu2 %v1911_v4  ;;  %v2260_v4 = vmov 0  }
  0x20   :  { %1960 = vset.pattern.permute.xlu2 %v2260_v4  ;;  %1949 = vset.pattern.permute.xlu1 %v2260_v4 }
  0x21   :  { %1966 = vset.pattern.permute.xlu0 %v2260_v4 }
  0x23   :  { %206 = vmatpush.bf16.msra.mxu0 %v1910_v5  ;;  %1929 = vmatpush.bf16.msra.mxu2 %v1910_v5 }
  0x27   :  { %207 = vmatpush.bf16.msra.mxu0 %v1909_v6  ;;  %1930 = vmatpush.bf16.msra.mxu2 %v1909_v6 }
  0x2b   :  { %208 = vmatpush.bf16.msra.mxu0 %v1908_v7  ;;  %1931 = vmatpush.bf16.msra.mxu2 %v1908_v7 }
  0x2e   :  { %209 = vmatmul.bf16.vlgmr.msra.gmra.mxu0 %v1900_v8  ;;  %229 = vmatmul.bf16.vlgmr.msra.gmra.mxu2 %v1904_v9 }
  0x3e   :  { %214 = vmatmul.bf16.gmra.mxu0 %v1901_v10  ;;  %234 = vmatmul.bf16.gmra.mxu2 %v1905_v11 }
  0x4e   :  { %219 = vmatmul.bf16.gmra.mxu0 %v1902_v12  ;;  %239 = vmatmul.bf16.gmra.mxu2 %v1906_v13 }
  0x5e   :  { %224 = vmatmul.bf16.gmra.mxu0 %v1903_v14  ;;  %244 = vmatmul.bf16.gmra.mxu2 %v1907_v15 }
  0xab   :  { %v2303_v16 = vpop.f32.mrf.mxu0 }
  0xac   :  { %v2427_v13 = vadd.f32 %v2308_v18, %v2303_v16 }
  0xae   :  { %3855 = vst [vmem:[#allocation26_spill] sm:$0xff] %v2427_v13  ;;  %v2441_v16 = vmul.f32 %v2427_v13, %v2427_v13 }
  0xb1   :  { %v230_v17 = vpop.f32.mrf.mxu2 }
  0xb2   :  { %v2343_v37 = vadd.f32 %v2308_v18, %v230_v17 }
  0xb3   :  { %v212_v19 = vpop.f32.mrf.mxu0 }
  0xb4   :  { %v2311_v20 = vadd.f32 %v2308_v18, %v212_v19  ;;  %3847 = vst [vmem:[#allocation18_spill] sm:$0xff] %v2343_v37  ;;  %v1844_v41 = vmul.f32 -1.442695, %v2343_v37 }
  0xb6   :  { %3842 = vst [vmem:[#allocation13_spill] sm:$0xff] %v2311_v20 }
  0xb9   :  { %v232_v21 = vpop.f32.mrf.mxu2 }
  0xba   :  { %v2348_v39 = vadd.f32 %v2308_v18, %v232_v21 }
  0xbb   :  { %v215_v22 = vpop.f32.mrf.mxu0 }
  0xbc   :  { %v2314_v23 = vadd.f32 %v2308_v18, %v215_v22  ;;  %3848 = vst [vmem:[#allocation19_spill] sm:$0xff] %v2348_v39  ;;  %v1845_v44 = vmul.f32 -1.442695, %v2348_v39  ;;  %v2389_v62 = vmul.f32 %v2348_v39, %v2348_v39 }
  0xbe   :  { %3843 = vst [vmem:[#allocation14_spill] sm:$0xff] %v2314_v23 }
  0xc1   :  { %v235_v24 = vpop.f32.mrf.mxu2 }
  0xc2   :  { %v2317_v25 = vadd.f32 %v2308_v18, %v235_v24 }
  0xc3   :  { %v2319_v26 = vpop.f32.mrf.mxu0 }
  0xc4   :  { %3844 = vst [vmem:[#allocation15_spill] sm:$0xff] %v2317_v25  ;;  %v2323_v27 = vmul.f32 %v2317_v25, %v2317_v25  ;;  %v1846_v40 = vmul.f32 -1.442695, %v2317_v25 }
  0xc6   :  { %627 = vadd.xlane.f32.xlu2 %v2323_v27 }
  0xc9   :  { %v237_v28 = vpop.f32.mrf.mxu2 }
  0xca   :  { %v2327_v29 = vadd.f32 %v2308_v18, %v237_v28 }
  0xcb   :  { %v220_v30 = vpop.f32.mrf.mxu0 }
  0xcc   :  { %3845 = vst [vmem:[#allocation16_spill] sm:$0xff] %v2327_v29  ;;  %v2331_v31 = vmul.f32 %v2327_v29, %v2327_v29  ;;  %v1847_v38 = vmul.f32 -1.442695, %v2327_v29  ;;  %v2409_v6 = vadd.f32 %v2308_v18, %v220_v30 }
  0xce   :  { %629 = vadd.xlane.f32.xlu2 %v2331_v31  ;;  %3853 = vst [vmem:[#allocation24_spill] sm:$0xff] %v2409_v6  ;;  %v2418_v10 = vmul.f32 %v2409_v6, %v2409_v6 }
  0xd1   :  { %v240_v32 = vpop.f32.mrf.mxu2 }
  0xd2   :  { %v2335_v33 = vadd.f32 %v2308_v18, %v240_v32 }
  0xd3   :  { %v222_v34 = vpop.f32.mrf.mxu0 }
  0xd4   :  { %3846 = vst [vmem:[#allocation17_spill] sm:$0xff] %v2335_v33  ;;  %v1848_v35 = vmul.f32 -1.442695, %v2335_v33  ;;  %v2340_v36 = vmul.f32 %v2335_v33, %v2335_v33  ;;  %v2376_v56 = vadd.f32 %v2308_v18, %v222_v34 }
  0xd6   :  { %1993 = vpow2.f32 %v1848_v35  ;;  %631 = vadd.xlane.f32.xlu1 %v2340_v36  ;;  %3851 = vst [vmem:[#allocation22_spill] sm:$0xff] %v2376_v56  ;;  %v2393_v63 = vmul.f32 %v2376_v56, %v2376_v56  ;;  %v2455_v35 = vadd.f32 %v2308_v18, %v2319_v26 }
  0xd7   :  { %1995 = vpow2.f32 %v1847_v38 }
  0xd8   :  { %1997 = vpow2.f32 %v1846_v40  ;;  %3856 = vst [vmem:[#allocation27_spill] sm:$0xff] %v2455_v35 }
  0xd9   :  { %v242_v42 = vpop.f32.mrf.mxu2  ;;  %1999 = vpow2.f32 %v1844_v41 }
  0xda   :  { %v2353_v43 = vadd.f32 %v2308_v18, %v242_v42  ;;  %v2461_v42 = vstv %s3819_s3  ;;  %s2261_s3 = smov [#allocation9]  }
  0xdb   :  { %v225_v45 = vpop.f32.mrf.mxu0  ;;  %s1756_s10 = sshll.u32 %s2261_s3, 4  ;;  %s1757_s10 = int_to_ptr.vmem [resolvable:$true] %s1756_s10 }
  0xdc   :  { %3849 = vst [vmem:[#allocation20_spill] sm:$0xff] %v2353_v43  ;;  %v1994_v46 = vpop.eup %1993  ;;  %v1849_v47 = vmul.f32 -1.442695, %v2353_v43  ;;  %v2358_v48 = vadd.f32 %v2308_v18, %v225_v45  ;;  %v2362_v49 = vmul.f32 %v2353_v43, %v2353_v43 }
  0xdd   :  { %v2364_v50 = vadd.f32 1.0, %v1994_v46  ;;  %v1996_v52 = vpop.eup %1995  ;;  %v2465_v46 = vmul.f32 %v2343_v37, %v2343_v37 }
  0xde   :  { %3850 = vst [vmem:[#allocation21_spill] sm:$0xff] %v2358_v48  ;;  %2001 = vpow2.f32 %v1849_v47  ;;  %633 = vadd.xlane.f32.xlu1 %v2362_v49  ;;  %v2369_v51 = vmul.f32 %v2358_v48, %v2358_v48  ;;  %v1998_v53 = vpop.eup %1997  ;;  %v2373_v55 = vadd.f32 1.0, %v1996_v52  ;;  %v2469_v47 = vmul.f32 %v2455_v35, %v2455_v35 }
  0xdf   :  { %2003 = vpow2.f32 %v1845_v44  ;;  %v2000_v58 = vpop.eup %1999  ;;  %v2381_v60 = vadd.f32 1.0, %v1998_v53  ;;  %vm503_vm4 = vweird.f32 %v2364_v50 }
  0xe0   :  { %619 = vadd.xlane.f32.xlu2 %v2369_v51  ;;  %2005 = vrcp.f32 %v2364_v50  ;;  %v2402_v3 = vadd.f32 1.0, %v2000_v58  ;;  %vm488_vm10 = vweird.f32 %v2373_v55 }
  0xe1   :  { %v245_v54 = vpop.f32.mrf.mxu2  ;;  %2007 = vrcp.f32 %v2373_v55  ;;  %vm473_vm12 = vweird.f32 %v2381_v60 }
  0xe2   :  { %v2379_v57 = vadd.f32 %v2308_v18, %v245_v54 }
  0xe3   :  { %v227_v53 = vpop.f32.mrf.mxu0 }
  0xe4   :  { %3852 = vst [vmem:[#allocation23_spill] sm:$0xff] %v2379_v57  ;;  %v2002_v59 = vpop.eup %2001  ;;  %v2385_v61 = vmul.f32 %v2379_v57, %v2379_v57  ;;  %v1850_v7 = vmul.f32 -1.442695, %v2379_v57 }
  0xe5   :  { %v2004_v0 = vpop.eup %2003  ;;  %v2395_v1 = vadd.f32 1.0, %v2002_v59 }
  0xe6   :  { %635 = vadd.xlane.f32.xlu0 %v2385_v61  ;;  %625 = vadd.xlane.f32.xlu1 %v2389_v62  ;;  %v2400_v2 = vpop.eup %2005  ;;  %v2405_v5 = vadd.f32 1.0, %v2004_v0 }
  0xe7   :  { %2009 = vrcp.f32 %v2395_v1  ;;  %v499_v11 = vmul.f32 %v2400_v2, %v2364_v50  ;;  %v2423_v12 = vpop.eup %2007  ;;  %v524_v54 = vand.u32 2147483648, %v2395_v1  ;;  %vm504_vm1 = vweird.f32 %v2400_v2 }
  0xe8   :  { %2011 = vrcp.f32 %v2381_v60  ;;  %617 = vadd.xlane.f32.xlu2 %v2393_v63  ;;  %v484_v24 = vmul.f32 %v2423_v12, %v2373_v55  ;;  %vm518_vm2 = vweird.f32 %v2395_v1  ;;  %v522_v4 = vand.u32 2147483647, %v2395_v1  ;;  %vm2500_vm5 = vmor %vm503_vm4, %vm504_vm1 }
  0xe9   :  { %v247_v8 = vpop.f32.mrf.mxu2  ;;  %2013 = vrcp.f32 %v2402_v3  ;;  %v500_v21 = vsub.f32 1.0, %v499_v11  ;;  %vm489_vm7 = vweird.f32 %v2423_v12  ;;  %vm443_vm4 = vweird.f32 %v2402_v3 }
  0xea   :  { %v2414_v9 = vadd.f32 %v2308_v18, %v247_v8  ;;  %2015 = vrcp.f32 %v2405_v5  ;;  %v485_v44 = vsub.f32 1.0, %v484_v24  ;;  %v509_v8 = vand.u32 2147483648, %v2364_v50  ;;  %vm2525_vm11 = vmor %vm488_vm10, %vm489_vm7 }
  0xeb   :  { %2017 = vpow2.f32 %v1850_v7  ;;  %v501_v38 = vmul.f32 %v2400_v2, %v500_v21  ;;  %vm523_vm6 = vcmp.eq.f32.partialorder %v522_v4, 8.507059e+37 }
  0xec   :  { %3854 = vst [vmem:[#allocation25_spill] sm:$0xff] %v2414_v9  ;;  %v1851_v14 = vmul.f32 -1.442695, %v2414_v9  ;;  %v2433_v15 = vmul.f32 %v2414_v9, %v2414_v9 }
  0xed   :  { %v2010_v17 = vpop.eup %2009  ;;  %v502_v0 = vadd.f32 %v2400_v2, %v501_v38 }
  0xee   :  { %v2435_v19 = vpop.eup %2011  ;;  %2019 = vpow2.f32 %v1851_v14  ;;  %637 = vadd.xlane.f32.xlu0 %v2433_v15  ;;  %615 = vadd.xlane.f32.xlu1 %v2418_v10  ;;  %v514_v22 = vmul.f32 %v2010_v17, %v2395_v1  ;;  %vm519_vm0 = vweird.f32 %v2010_v17  ;;  %v486_v14 = vmul.f32 %v2423_v12, %v485_v44 }
  0xef   :  { %v2447_v30 = vpop.eup %2013  ;;  %v469_v32 = vmul.f32 %v2435_v19, %v2381_v60  ;;  %vm2485_vm3 = vmor %vm518_vm2, %vm519_vm0  ;;  %v507_v1 = vand.u32 2147483647, %v2364_v50  ;;  %v506_v50 = vsel %vm2500_vm5, %v2400_v2, %v502_v0  ;;  %vm474_vm9 = vweird.f32 %v2435_v19 }
  0xf0   :  { %607 = vadd.xlane.f32.xlu2 %v2441_v16  ;;  %v515_v28 = vsub.f32 1.0, %v514_v22  ;;  %v2451_v34 = vpop.eup %2015  ;;  %v439_v21 = vmul.f32 %v2447_v30, %v2402_v3  ;;  %v2493_v22 = vadd.f32 %v2308_v18, %v227_v53  ;;  %v487_v44 = vadd.f32 %v2423_v12, %v486_v14  ;;  %vm2540_vm13 = vmor %vm473_vm12, %vm474_vm9 }
  0xf1   :  { %v2018_v41 = vpop.eup %2017  ;;  %v470_v58 = vsub.f32 1.0, %v469_v32  ;;  %v454_v59 = vmul.f32 %v2451_v34, %v2405_v5  ;;  %v525_v32 = vor.u32 1.1754944e-38, %v524_v54  ;;  %vm508_vm8 = vcmp.eq.f32.partialorder %v507_v1, 8.507059e+37 }
  0xf2   :  { %v516_v40 = vmul.f32 %v2010_v17, %v515_v28  ;;  %v2482_v7 = vadd.f32 1.0, %v2018_v41  ;;  %3859 = vst [vmem:[#allocation28_spill] sm:$0xff] %v2493_v22  ;;  %v2507_v18 = vmul.f32 %v2493_v22, %v2493_v22  ;;  %v492_v2 = vand.u32 2147483647, %v2373_v55 }
  0xf3   :  { %v471_v38 = vmul.f32 %v2435_v19, %v470_v58  ;;  %vm444_vm0 = vweird.f32 %v2447_v30  ;;  %vm459_vm1 = vweird.f32 %v2451_v34  ;;  %vm458_vm2 = vweird.f32 %v2405_v5 }
  0xf4   :  { %v2020_v45 = vpop.eup %2019  ;;  %v517_v26 = vadd.f32 %v2010_v17, %v516_v40  ;;  %v455_v40 = vsub.f32 1.0, %v454_v59  ;;  %v479_v59 = vand.u32 2147483648, %v2381_v60  ;;  %vm493_vm14 = vcmp.eq.f32.partialorder %v492_v2, 8.507059e+37  ;;  %vm445_vm5 = vmor %vm443_vm4, %vm444_vm0 }
  0xf5   :  { %v2471_v52 = vadd.f32 1.0, %v2020_v45  ;;  %v494_v45 = vand.u32 2147483648, %v2373_v55  ;;  %v472_v54 = vadd.f32 %v2435_v19, %v471_v38  ;;  %v491_v55 = vsel %vm2525_vm11, %v2423_v12, %v487_v44 }
  0xf6   :  { %623 = vadd.xlane.f32.xlu0 %v2465_v46  ;;  %613 = vadd.xlane.f32.xlu1 %v2469_v47  ;;  %v521_v24 = vsel %vm2485_vm3, %v2010_v17, %v517_v26  ;;  %v510_v17 = vor.u32 1.1754944e-38, %v509_v8  ;;  %v440_v26 = vsub.f32 1.0, %v439_v21  ;;  %v477_v8 = vand.u32 2147483647, %v2381_v60  ;;  %vm460_vm3 = vmor %vm458_vm2, %vm459_vm1 }
  0xf7   :  { %2021 = vrcp.f32 %v2471_v52  ;;  %v526_v41 = vsel %vm523_vm6, %v525_v32, %v521_v24  ;;  %v456_v11 = vmul.f32 %v2451_v34, %v455_v40  ;;  %v495_v1 = vor.u32 1.1754944e-38, %v494_v45 }
  0xf8   :  { %2023 = vrcp.f32 %v2482_v7  ;;  %v511_v53 = vsel %vm508_vm8, %v510_v17, %v506_v50  ;;  %v572_v58 = vmul.f32 %v2461_v42, %v526_v41  ;;  %v2548_v60 = vmul.f32 %v2314_v23, %v2314_v23 }
  0xf9   :  { %v571_v14 = vmul.f32 %v2461_v42, %v511_v53  ;;  %v476_v12 = vsel %vm2540_vm13, %v2435_v19, %v472_v54  ;;  %v441_v28 = vmul.f32 %v2447_v30, %v440_v26  ;;  %v480_v38 = vor.u32 1.1754944e-38, %v479_v59 }
  0xfa   :  { %v2554_v32 = vadd.f32 1.1, %v572_v58  ;;  %v496_v40 = vsel %vm493_vm14, %v495_v1, %v491_v55  ;;  %vm478_vm15 = vcmp.eq.f32.partialorder %v477_v8, 8.507059e+37  ;;  %v457_v17 = vadd.f32 %v2451_v34, %v456_v11 }
  0xfb   :  { %v2561_v41 = vadd.f32 1.1, %v571_v14  ;;  %v481_v19 = vsel %vm478_vm15, %v480_v38, %v476_v12  ;;  %v464_v44 = vand.u32 2147483648, %v2405_v5  ;;  %v570_v26 = vmul.f32 %v2461_v42, %v496_v40 }
  0xfc   :  { %v442_v53 = vadd.f32 %v2447_v30, %v441_v28  ;;  %v462_v54 = vand.u32 2147483647, %v2405_v5  ;;  %v449_v58 = vand.u32 2147483648, %v2402_v3  ;;  %v569_v0 = vmul.f32 %v2461_v42, %v481_v19 }
  0xfd   :  { %v2529_v4 = vpop.eup %2021  ;;  %v1961_v2 = vpack.i.bf16 %v2554_v32, %v2561_v41  ;;  %v447_v8 = vand.u32 2147483647, %v2402_v3  ;;  %v461_v55 = vsel %vm460_vm3, %v2451_v34, %v457_v17  ;;  %v465_v5 = vor.u32 1.1754944e-38, %v464_v44 }
  0xfe   :  { %621 = vadd.xlane.f32.xlu0 %v2507_v18  ;;  %v2544_v24 = vpop.eup %2023  ;;  %v544_v50 = vmul.f32 %v2529_v4, %v2471_v52  ;;  %v2580_v14 = vadd.f32 1.1, %v570_v26  ;;  %v446_v21 = vsel %vm445_vm5, %v2447_v30, %v442_v53  ;;  %vm463_vm6 = vcmp.eq.f32.partialorder %v462_v54, 8.507059e+37 }
  0xff   :  { %v529_v45 = vmul.f32 %v2544_v24, %v2482_v7  ;;  %v450_v1 = vor.u32 1.1754944e-38, %v449_v58  ;;  %v466_v12 = vsel %vm463_vm6, %v465_v5, %v461_v55  ;;  %v2584_v38 = vadd.f32 1.1, %v569_v0 }
 0x100   :  { %v545_v59 = vsub.f32 1.0, %v544_v50  ;;  %vm448_vm7 = vcmp.eq.f32.partialorder %v447_v8, 8.507059e+37  ;;  %v2588_v3 = vmul.f32 %v2311_v20, %v2311_v20  ;;  %v568_v30 = vmul.f32 %v2461_v42, %v466_v12 }
 0x101   :  { %v530_v11 = vsub.f32 1.0, %v529_v45  ;;  %v451_v34 = vsel %vm448_vm7, %v450_v1, %v446_v21  ;;  %v1950_v50 = vpack.i.bf16 %v2580_v14, %v2584_v38  ;;  %vm549_vm8 = vweird.f32 %v2529_v4 }
 0x102   :  { %v546_v28 = vmul.f32 %v2529_v4, %v545_v59  ;;  %v1836_v19 = vmul.f32 -1.442695, %v2427_v13  ;;  %v567_v44 = vmul.f32 %v2461_v42, %v451_v34  ;;  %v554_v45 = vand.u32 2147483648, %v2471_v52 }
 0x103   :  { %v531_v40 = vmul.f32 %v2544_v24, %v530_v11  ;;  %vm534_vm9 = vweird.f32 %v2544_v24  ;;  %vm548_vm10 = vweird.f32 %v2471_v52  ;;  %v552_v53 = vand.u32 2147483647, %v2471_v52 }
 0x104   :  { %v547_v17 = vadd.f32 %v2529_v4, %v546_v28  ;;  %v2604_v54 = vadd.f32 1.1, %v568_v30  ;;  %vm550_vm11 = vmor %vm548_vm10, %vm549_vm8  ;;  %vm533_vm12 = vweird.f32 %v2482_v7  ;;  %v537_v58 = vand.u32 2147483647, %v2482_v7 }
 0x105   :  { %v532_v26 = vadd.f32 %v2544_v24, %v531_v40  ;;  %v1843_v0 = vmul.f32 -1.442695, %v2493_v22  ;;  %v583_v8 = vadd.f32 1.1, %v567_v44  ;;  %vm535_vm13 = vmor %vm533_vm12, %vm534_vm9  ;;  %v555_v55 = vor.u32 1.1754944e-38, %v554_v45 }
 0x106   :  { %611 = vadd.xlane.f32.xlu0 %v2548_v60  ;;  %v551_v59 = vsel %vm550_vm11, %v2529_v4, %v547_v17  ;;  %2025 = vpow2.f32 %v1836_v19  ;;  %vm553_vm14 = vcmp.eq.f32.partialorder %v552_v53, 8.507059e+37  ;;  %v1842_v1 = vmul.f32 -1.442695, %v2358_v48 }
 0x107   :  { %v536_v5 = vsel %vm535_vm13, %v2544_v24, %v532_v26  ;;  %v1955_v52 = vpack.i.bf16 %v2604_v54, %v583_v8  ;;  %v556_v21 = vsel %vm553_vm14, %v555_v55, %v551_v59  ;;  %vm538_vm15 = vcmp.eq.f32.partialorder %v537_v58, 8.507059e+37 }
 0x108   :  { %1962 = vperm.xlu2 %1960, %v1961_v2   ;;  %v539_v2 = vand.u32 2147483648, %v2482_v7  ;;  %v1838_v7 = vmul.f32 -1.442695, %v2314_v23  ;;  %2027 = vpow2.f32 %v1843_v0  ;;  %v574_v12 = vmul.f32 %v2461_v42, %v556_v21 }
 0x109   :  { %2029 = vpow2.f32 %v1842_v1  ;;  %v1839_v24 = vmul.f32 -1.442695, %v2455_v35  ;;  %v1837_v40 = vmul.f32 -1.442695, %v2311_v20  ;;  %v1840_v19 = vmul.f32 -1.442695, %v2409_v6 }
 0x10a   :  { %v540_v11 = vor.u32 1.1754944e-38, %v539_v2  ;;  %2031 = vpow2.f32 %v1838_v7  ;;  %v1841_v45 = vmul.f32 -1.442695, %v2376_v56  ;;  %v2685_v35 = vmul.f32 %v2580_v14, %v2580_v14 }
 0x10b   :  { %2033 = vpow2.f32 %v1839_v24 }
 0x10c   :  { %v541_v4 = vsel %vm538_vm15, %v540_v11, %v536_v5  ;;  %v2026_v28 = vpop.eup %2025  ;;  %2035 = vpow2.f32 %v1837_v40 }
 0x10d   :  { %v573_v34 = vmul.f32 %v2461_v42, %v541_v4  ;;  %v2621_v17 = vadd.f32 1.0, %v2026_v28 }
 0x10e   :  { %609 = vadd.xlane.f32.xlu0 %v2588_v3  ;;  %v2028_v30 = vpop.eup %2027 }
 0x10f   :  { %1951 = vperm.xlu1 %1949, %v1950_v50   ;;  %v2619_v50 = vadd.f32 1.1, %v574_v12  ;;  %v2624_v44 = vadd.f32 1.1, %v573_v34  ;;  %v2030_v26 = vpop.eup %2029  ;;  %v2627_v53 = vadd.f32 1.0, %v2028_v30  ;;  %2037 = vrcp.f32 %v2621_v17 }
 0x110   :  { %v2032_v58 = vpop.eup %2031  ;;  %2039 = vpow2.f32 %v1840_v19  ;;  %v2632_v59 = vadd.f32 1.0, %v2030_v26  ;;  %vm323_vm0 = vweird.f32 %v2621_v17  ;;  %v329_v9 = vand.u32 2147483648, %v2621_v17 }
 0x111   :  { %v1967_v2 = vpack.i.bf16 %v2619_v50, %v2624_v44  ;;  %2041 = vpow2.f32 %v1841_v45  ;;  %v2634_v0 = vadd.f32 1.0, %v2032_v58  ;;  %v2034_v55 = vpop.eup %2033  ;;  %v679_v45 = vmul.f32 %v583_v8, %v583_v8 }
 0x112   :  { %2043 = vrcp.f32 %v2627_v53  ;;  %v2036_v5 = vpop.eup %2035  ;;  %v2641_v21 = vadd.f32 1.0, %v2034_v55  ;;  %vm428_vm1 = vweird.f32 %v2627_v53  ;;  %v432_v48 = vand.u32 2147483647, %v2627_v53 }
 0x113   :  { %2045 = vrcp.f32 %v2632_v59  ;;  %v2643_v7 = vadd.f32 1.0, %v2036_v5  ;;  %vm413_vm4 = vweird.f32 %v2632_v59  ;;  %vm353_vm7 = vweird.f32 %v2634_v0 }
 0x114   :  { %2047 = vrcp.f32 %v2634_v0  ;;  %vm433_vm11 = vcmp.eq.f32.partialorder %v432_v48, 8.507059e+37  ;;  %v359_v29 = vand.u32 2147483648, %v2634_v0  ;;  %vm368_vm15 = vweird.f32 %v2641_v21 }
 0x115   :  { %2049 = vrcp.f32 %v2641_v21 }
 0x116   :  { %2051 = vrcp.f32 %v2643_v7 }
 0x117   :  { %1956 = vperm.xlu1 %1949, %v1955_v52   ;;  %v2637_v52 = vpop.eup %2037 }
 0x118   :  { %v2040_v11 = vpop.eup %2039  ;;  %v319_v28 = vmul.f32 %v2637_v52, %v2621_v17  ;;  %vm324_vm3 = vweird.f32 %v2637_v52 }
 0x119   :  { %v2042_v1 = vpop.eup %2041  ;;  %v2647_v12 = vadd.f32 1.0, %v2040_v11  ;;  %vm2736_vm9 = vmor %vm323_vm0, %vm324_vm3 }
 0x11a   :  { %v2645_v4 = vpop.eup %2043  ;;  %v2655_v24 = vadd.f32 1.0, %v2042_v1  ;;  %v320_v19 = vsub.f32 1.0, %v319_v28  ;;  %v2674_v28 = vadd.f32 -1.0, %v679_v45 }
 0x11b   :  { %v2652_v34 = vpop.eup %2045  ;;  %v424_v40 = vmul.f32 %v2645_v4, %v2627_v53  ;;  %2053 = vrcp.f32 %v2647_v12  ;;  %vm429_vm2 = vweird.f32 %v2645_v4 }
 0x11c   :  { %v2659_v30 = vpop.eup %2047  ;;  %v409_v26 = vmul.f32 %v2652_v34, %v2632_v59  ;;  %2055 = vrcp.f32 %v2655_v24  ;;  %v321_v1 = vmul.f32 %v2637_v52, %v320_v19  ;;  %v2689_v19 = vmul.f32 %v2604_v54, %v2604_v54  ;;  %vm2719_vm6 = vmor %vm428_vm1, %vm429_vm2 }
 0x11d   :  { %v425_v58 = vsub.f32 1.0, %v424_v40  ;;  %v349_v55 = vmul.f32 %v2659_v30, %v2634_v0  ;;  %v2669_v5 = vpop.eup %2049  ;;  %v434_v54 = vand.u32 2147483648, %v2627_v53  ;;  %vm414_vm5 = vweird.f32 %v2652_v34 }
 0x11e   :  { %v2671_v11 = vpop.eup %2051  ;;  %v410_v8 = vsub.f32 1.0, %v409_v26  ;;  %v364_v40 = vmul.f32 %v2669_v5, %v2641_v21  ;;  %vm354_vm8 = vweird.f32 %v2659_v30  ;;  %vm2740_vm10 = vmor %vm413_vm4, %vm414_vm5  ;;  %vm369_vm0 = vweird.f32 %v2669_v5 }
 0x11f   :  { %v426_v23 = vmul.f32 %v2645_v4, %v425_v58  ;;  %v2694_v45 = vmul.f32 %v2671_v11, %v2643_v7  ;;  %v435_v53 = vor.u32 1.1754944e-38, %v434_v54  ;;  %v357_v54 = vand.u32 2147483647, %v2634_v0  ;;  %vm2750_vm12 = vmor %vm353_vm7, %vm354_vm8 }
 0x120   :  { %v411_v14 = vmul.f32 %v2652_v34, %v410_v8  ;;  %vm383_vm1 = vweird.f32 %v2647_v12  ;;  %vm398_vm3 = vweird.f32 %v2655_v24  ;;  %vm2792_vm5 = vmor %vm368_vm15, %vm369_vm0 }
 0x121   :  { %v2676_v13 = vpop.eup %2053  ;;  %v427_v56 = vadd.f32 %v2645_v4, %v426_v23  ;;  %vm2773_vm14 = vcmp.eq.f32.partialorder %v357_v54, 8.507059e+37 }
 0x122   :  { %1968 = vperm.xlu0 %1966, %v1967_v2   ;;  %v681_v2 = vmul.f32 %v2584_v38, %v2584_v38  ;;  %v350_v38 = vsub.f32 1.0, %v349_v55  ;;  %v2696_v26 = vpop.eup %2055  ;;  %v379_v58 = vmul.f32 %v2676_v13, %v2647_v12  ;;  %vm384_vm2 = vweird.f32 %v2676_v13 }
 0x123   :  { %v394_v23 = vmul.f32 %v2696_v26, %v2655_v24  ;;  %vm399_vm4 = vweird.f32 %v2696_v26 }
 0x124   :  { %v2678_v20 = vadd.f32 -1.0, %v681_v2  ;;  %v2701_v2 = vadd.f32 %v2637_v52, %v321_v1  ;;  %v351_v22 = vmul.f32 %v2659_v30, %v350_v38  ;;  %v365_v1 = vsub.f32 1.0, %v364_v40  ;;  %vm2814_vm7 = vmor %vm398_vm3, %vm399_vm4 }
 0x125   :  { %v417_v38 = vand.u32 2147483647, %v2632_v59  ;;  %v419_v40 = vand.u32 2147483648, %v2632_v59  ;;  %v380_v55 = vsub.f32 1.0, %v379_v58  ;;  %v395_v58 = vsub.f32 1.0, %v394_v23 }
 0x126   :  { %v366_v48 = vmul.f32 %v2669_v5, %v365_v1 }
 0x127   :  { %vm2756_vm13 = vcmp.eq.f32.partialorder %v417_v38, 8.507059e+37  ;;  %v420_v0 = vor.u32 1.1754944e-38, %v419_v40  ;;  %v381_v23 = vmul.f32 %v2676_v13, %v380_v55  ;;  %v389_v55 = vand.u32 2147483648, %v2647_v12 }
 0x128   :  { %v367_v25 = vadd.f32 %v2669_v5, %v366_v48  ;;  %v374_v40 = vand.u32 2147483648, %v2641_v21  ;;  %v402_v48 = vand.u32 2147483647, %v2655_v24 }
 0x129   :  { %v382_v59 = vadd.f32 %v2676_v13, %v381_v23  ;;  %v404_v23 = vand.u32 2147483648, %v2655_v24 }
 0x139   :  { %v628_v6 = vpop.xlane.xlu2 %627 }
 0x13a   :  { %v649_v37 = vsub.f32 %v628_v6, %v2323_v27  ;;  %v412_v6 = vadd.f32 %v2652_v34, %v411_v14  ;;  %v352_v14 = vadd.f32 %v2659_v30, %v351_v22  ;;  %v335_v22 = vsub.f32 1.0, %v2694_v45 }
 0x13b   :  { %v360_v45 = vor.u32 1.1754944e-38, %v359_v29 }
 0x13c   :  { %v2729_v27 = vmax.f32 %v649_v37, 1e-08  ;;  %v431_v37 = vsel %vm2719_vm6, %v2645_v4, %v427_v56  ;;  %v326_v56 = vsel %vm2736_vm9, %v2637_v52, %v2701_v2  ;;  %v416_v4 = vsel %vm2740_vm10, %v2652_v34, %v412_v6  ;;  %vm2804_vm6 = vmor %vm383_vm1, %vm384_vm2 }
 0x13d   :  { %v436_v8 = vsel %vm433_vm11, %v435_v53, %v431_v37  ;;  %v356_v1 = vsel %vm2750_vm12, %v2659_v30, %v352_v14  ;;  %v396_v34 = vmul.f32 %v2696_v26, %v395_v58  ;;  %v372_v30 = vand.u32 2147483647, %v2641_v21 }
 0x13e   :  { %2057 = vrcp.f32 %v2729_v27  ;;  %v421_v14 = vsel %vm2756_vm13, %v420_v0, %v416_v4  ;;  %v566_v54 = vmul.f32 %v2461_v42, %v436_v8  ;;  %v387_v21 = vand.u32 2147483647, %v2647_v12 }
 0x13f   :  { %v397_v58 = vadd.f32 %v2696_v26, %v396_v34  ;;  %v361_v33 = vsel %vm2773_vm14, %v360_v45, %v356_v1  ;;  %v371_v8 = vsel %vm2792_vm5, %v2669_v5, %v367_v25  ;;  %vm2821_vm8 = vcmp.eq.f32.partialorder %v372_v30, 8.507059e+37 }
 0x140   :  { %v864_v34 = vand.u32 2147483648, %v2729_v27  ;;  %v386_v43 = vsel %vm2804_vm6, %v2676_v13, %v382_v59  ;;  %v390_v1 = vor.u32 1.1754944e-38, %v389_v55  ;;  %vm2832_vm11 = vcmp.eq.f32.partialorder %v387_v21, 8.507059e+37 }
 0x141   :  { %v630_v38 = vpop.xlane.xlu2 %629  ;;  %v401_v30 = vsel %vm2814_vm7, %v2696_v26, %v397_v58  ;;  %vm2840_vm12 = vcmp.eq.f32.partialorder %v402_v48, 8.507059e+37  ;;  %v405_v13 = vor.u32 1.1754944e-38, %v404_v23  ;;  %vm858_vm13 = vweird.f32 %v2729_v27 }
 0x142   :  { %v650_v53 = vsub.f32 %v630_v38, %v2331_v31  ;;  %v375_v38 = vor.u32 1.1754944e-38, %v374_v40  ;;  %v865_v31 = vor.u32 1.1754944e-38, %v864_v34  ;;  %v330_v21 = vor.u32 1.1754944e-38, %v329_v9 }
 0x143   :  { %vm338_vm1 = vweird.f32 %v2643_v7  ;;  %vm339_vm2 = vweird.f32 %v2671_v11  ;;  %v391_v48 = vsel %vm2832_vm11, %v390_v1, %v386_v43  ;;  %v561_v0 = vmul.f32 %v2461_v42, %v361_v33 }
 0x144   :  { %v2058_v6 = vpop.eup %2057  ;;  %v2826_v24 = vmax.f32 %v650_v53, 1e-08  ;;  %v3890_v53 = vand.u32 2147483647, %v2621_v17  ;;  %v376_v9 = vsel %vm2821_vm8, %v375_v38, %v371_v8  ;;  %vm2880_vm3 = vmor %vm338_vm1, %vm339_vm2  ;;  %v683_v12 = vmul.f32 %v2561_v41, %v2561_v41 }
 0x145   :  { %v854_v37 = vmul.f32 %v2058_v6, %v2729_v27  ;;  %vm859_vm10 = vweird.f32 %v2058_v6  ;;  %v563_v39 = vmul.f32 %v2461_v42, %v391_v48  ;;  %v565_v2 = vmul.f32 %v2461_v42, %v421_v14 }
 0x146   :  { %vm2847_vm14 = vcmp.eq.f32.partialorder %v3890_v53, 8.507059e+37  ;;  %vm860_vm15 = vmor %vm858_vm13, %vm859_vm10  ;;  %2059 = vrcp.f32 %v2826_v24  ;;  %v685_v1 = vmul.f32 %v2624_v44, %v2624_v44  ;;  %v2912_v5 = vadd.f32 -1.0, %v2689_v19 }
 0x147   :  { %v855_v4 = vsub.f32 1.0, %v854_v37  ;;  %v862_v37 = vand.u32 2147483647, %v2729_v27  ;;  %v2857_v27 = vadd.f32 1.1, %v566_v54  ;;  %v406_v54 = vsel %vm2840_vm12, %v405_v13, %v401_v30 }
 0x148   :  { %v564_v43 = vmul.f32 %v2461_v42, %v406_v54  ;;  %v2922_v40 = vadd.f32 -1.0, %v683_v12  ;;  %vm873_vm5 = vweird.f32 %v2826_v24 }
 0x149   :  { %v856_v45 = vmul.f32 %v2058_v6, %v855_v4  ;;  %v632_v29 = vpop.xlane.xlu1 %631  ;;  %vm863_vm0 = vcmp.eq.f32.partialorder %v862_v37, 8.507059e+37  ;;  %v342_v4 = vand.u32 2147483647, %v2643_v7  ;;  %v678_v14 = vmul.f32 %v2857_v27, %v2857_v27 }
 0x14a   :  { %v651_v25 = vsub.f32 %v632_v29, %v2340_v36  ;;  %v336_v36 = vmul.f32 %v2671_v11, %v335_v22  ;;  %v344_v22 = vand.u32 2147483648, %v2643_v7  ;;  %v684_v7 = vmul.f32 %v2554_v32, %v2554_v32 }
 0x14b   :  { %v857_v55 = vadd.f32 %v2058_v6, %v856_v45  ;;  %vm343_vm9 = vcmp.eq.f32.partialorder %v342_v4, 8.507059e+37  ;;  %v2906_v37 = vadd.f32 1.1, %v561_v0  ;;  %v2909_v29 = vadd.f32 -1.0, %v2685_v35 }
 0x14c   :  { %v2853_v26 = vmax.f32 %v651_v25, 1e-08  ;;  %v2890_v33 = vpop.eup %2059  ;;  %v345_v34 = vor.u32 1.1754944e-38, %v344_v22  ;;  %v2916_v25 = vadd.f32 1.1, %v563_v39  ;;  %v2920_v30 = vadd.f32 -1.0, %v684_v7 }
 0x14d   :  { %v861_v58 = vsel %vm860_vm15, %v2058_v6, %v857_v55  ;;  %v337_v6 = vadd.f32 %v2671_v11, %v336_v36  ;;  %3895 = vst [vmem:[#allocation29_spill] sm:$0xff] %v2906_v37  ;;  %v686_v35 = vmul.f32 %v2619_v50, %v2619_v50  ;;  %v2929_v19 = vadd.f32 1.1, %v564_v43 }
 0x14e   :  { %v866_v17 = vsel %vm863_vm0, %v865_v31, %v861_v58  ;;  %2061 = vrcp.f32 %v2853_v26  ;;  %v2935_v36 = vadd.f32 -1.0, %v685_v1  ;;  %v2937_v31 = vadd.f32 1.1, %v565_v2 }
 0x14f   :  { %v2863_v23 = vmul.f32 %v2678_v20, %v866_v17  ;;  %v331_v20 = vsel %vm2847_vm14, %v330_v21, %v326_v56  ;;  %v562_v56 = vmul.f32 %v2461_v42, %v376_v9  ;;  %v341_v32 = vsel %vm2880_vm3, %v2671_v11, %v337_v6 }
 0x150   :  { %v559_v41 = vmul.f32 %v2461_v42, %v331_v20  ;;  %v869_v11 = vmul.f32 %v2890_v33, %v2826_v24  ;;  %v346_v13 = vsel %vm343_vm9, %v345_v34, %v341_v32  ;;  %v2939_v21 = vadd.f32 -1.0, %v678_v14 }
 0x151   :  { %v634_v38 = vpop.xlane.xlu1 %633  ;;  %2063 = vrsqrt.f32 %v2863_v23  ;;  %v2931_v53 = vadd.f32 1.1, %v562_v56  ;;  %v673_v58 = vmul.f32 %v2906_v37, %v2906_v37  ;;  %v675_v9 = vmul.f32 %v2916_v25, %v2916_v25 }
 0x152   :  { %v652_v52 = vsub.f32 %v634_v38, %v2362_v49  ;;  %v2933_v59 = vadd.f32 1.1, %v559_v41  ;;  %v870_v17 = vsub.f32 1.0, %v869_v11  ;;  %v560_v6 = vmul.f32 %v2461_v42, %v346_v13 }
 0x153   :  { %v620_v49 = vpop.xlane.xlu2 %619  ;;  %3896 = vst [vmem:[#allocation30_spill] sm:$0xff] %v2931_v53  ;;  %v2953_v8 = vadd.f32 -1.0, %v686_v35  ;;  %v674_v7 = vmul.f32 %v2931_v53, %v2931_v53  ;;  %v2969_v39 = vadd.f32 -1.0, %v673_v58  ;;  %v2974_v56 = vadd.f32 -1.0, %v675_v9 }
 0x154   :  { %v2902_v45 = vmax.f32 %v652_v52, 1e-08  ;;  %v2918_v44 = vpop.eup %2061  ;;  %3897 = vst [vmem:[#allocation31_spill] sm:$0xff] %v2933_v59  ;;  %v645_v48 = vsub.f32 %v620_v49, %v2369_v51  ;;  %v676_v51 = vmul.f32 %v2929_v19, %v2929_v19  ;;  %v671_v42 = vmul.f32 %v2933_v59, %v2933_v59 }
 0x155   :  { %v884_v4 = vmul.f32 %v2918_v44, %v2853_v26  ;;  %v871_v52 = vmul.f32 %v2890_v33, %v870_v17  ;;  %v2976_v34 = vadd.f32 1.1, %v560_v6  ;;  %v2986_v11 = vadd.f32 -1.0, %v674_v7 }
 0x156   :  { %2065 = vrcp.f32 %v2902_v45  ;;  %v2978_v32 = vmax.f32 %v645_v48, 1e-08  ;;  %v2984_v14 = vadd.f32 -1.0, %v676_v51  ;;  %v2988_v13 = vadd.f32 -1.0, %v671_v42 }
 0x157   :  { %v2925_v55 = vpop.eup %2063  ;;  %3898 = vst [vmem:[#allocation32_spill] sm:$0xff] %v2976_v34  ;;  %v885_v43 = vsub.f32 1.0, %v884_v4  ;;  %v877_v35 = vand.u32 2147483647, %v2826_v24  ;;  %v879_v58 = vand.u32 2147483648, %v2826_v24  ;;  %v677_v17 = vmul.f32 %v2937_v31, %v2937_v31 }
 0x158   :  { %v1064_v20 = vmul.f32 %v2925_v55, %v2863_v23  ;;  %3899 = vst [vmem:[#allocation33_spill] sm:$0xff] %v2988_v13  ;;  %v872_v48 = vadd.f32 %v2890_v33, %v871_v52  ;;  %vm874_vm4 = vweird.f32 %v2890_v33  ;;  %vm888_vm8 = vweird.f32 %v2853_v26 }
 0x159   :  { %v636_v22 = vpop.xlane.xlu0 %635  ;;  %v626_v50 = vpop.xlane.xlu1 %625  ;;  %v886_v6 = vmul.f32 %v2918_v44, %v885_v43  ;;  %vm3011_vm6 = vmor %vm873_vm5, %vm874_vm4  ;;  %vm3015_vm7 = vcmp.eq.f32.partialorder %v877_v35, 8.507059e+37  ;;  %v3020_v24 = vadd.f32 -1.0, %v677_v17  ;;  %vm889_vm11 = vweird.f32 %v2918_v44 }
 0x15a   :  { %v653_v54 = vsub.f32 %v636_v22, %v2385_v61  ;;  %v648_v0 = vsub.f32 %v626_v50, %v2389_v62  ;;  %v1065_v1 = vmul.f32 %v2925_v55, %v1064_v20  ;;  %v892_v22 = vand.u32 2147483647, %v2853_v26  ;;  %vm3051_vm12 = vmor %vm888_vm8, %vm889_vm11 }
 0x15b   :  { %v618_v41 = vpop.xlane.xlu2 %617  ;;  %v907_v9 = vand.u32 2147483647, %v2902_v45  ;;  %vm903_vm13 = vweird.f32 %v2902_v45  ;;  %vm1070_vm14 = vcmp.eq.f32.partialorder %v2863_v23, inf  ;;  %vm1072_vm15 = vcmp.eq.f32.partialorder %v2863_v23, 0.0 }
 0x15c   :  { %v2961_v12 = vpop.eup %2065  ;;  %v2963_v38 = vmax.f32 %v653_v54, 1e-08  ;;  %v2965_v61 = vmax.f32 %v648_v0, 1e-08  ;;  %v1066_v4 = vmul.f32 0.5, %v1065_v1  ;;  %v3004_v54 = vmul.f32 %v2976_v34, %v2976_v34 }
 0x15d   :  { %v899_v49 = vmul.f32 %v2961_v12, %v2902_v45  ;;  %v894_v0 = vand.u32 2147483648, %v2853_v26  ;;  %v880_v1 = vor.u32 1.1754944e-38, %v879_v58  ;;  %v644_v62 = vsub.f32 %v618_v41, %v2393_v63 }
 0x15e   :  { %2067 = vrcp.f32 %v2963_v38  ;;  %3900 = vst [vmem:[#allocation34_spill] sm:$0xff] %v3004_v54  ;;  %vm3026_vm10 = vcmp.eq.f32.partialorder %v892_v22, 8.507059e+37  ;;  %v887_v58 = vadd.f32 %v2918_v44, %v886_v6  ;;  %v1067_v41 = vsub.f32 1.5, %v1066_v4 }
 0x15f   :  { %2069 = vrcp.f32 %v2965_v61  ;;  %v900_v20 = vsub.f32 1.0, %v899_v49  ;;  %v895_v17 = vor.u32 1.1754944e-38, %v894_v0  ;;  %v1073_v22 = vand.u32 2147483648, %v2863_v23 }
 0x160   :  { %2071 = vrcp.f32 %v2978_v32  ;;  %v909_v6 = vand.u32 2147483648, %v2902_v45  ;;  %v3047_v57 = vmax.f32 %v644_v62, 1e-08  ;;  %v891_v62 = vsel %vm3051_vm12, %v2918_v44, %v887_v58 }
 0x161   :  { %v638_v50 = vpop.xlane.xlu0 %637  ;;  %v616_v7 = vpop.xlane.xlu1 %615  ;;  %v804_v26 = vand.u32 2147483648, %v2978_v32  ;;  %v1068_v43 = vmul.f32 %v2925_v55, %v1067_v41  ;;  %vm904_vm0 = vweird.f32 %v2961_v12  ;;  %vm3076_vm1 = vcmp.eq.f32.partialorder %v907_v9, 8.507059e+37 }
 0x162   :  { %v654_v51 = vsub.f32 %v638_v50, %v2433_v15  ;;  %v876_v15 = vsel %vm3011_vm6, %v2890_v33, %v872_v48  ;;  %v643_v63 = vsub.f32 %v616_v7, %v2418_v10  ;;  %v901_v33 = vmul.f32 %v2961_v12, %v900_v20  ;;  %vm3087_vm2 = vmor %vm903_vm13, %vm904_vm0 }
 0x163   :  { %v881_v2 = vsel %vm3015_vm7, %v880_v1, %v876_v15  ;;  %v608_v10 = vpop.xlane.xlu2 %607  ;;  %v910_v58 = vor.u32 1.1754944e-38, %v909_v6  ;;  %v896_v55 = vsel %vm3026_vm10, %v895_v17, %v891_v62  ;;  %v922_v41 = vand.u32 2147483647, %v2963_v38 }
 0x164   :  { %v3009_v42 = vpop.eup %2067  ;;  %v3038_v48 = vmax.f32 %v654_v51, 1e-08  ;;  %v3064_v7 = vmax.f32 %v643_v63, 1e-08  ;;  %v902_v1 = vadd.f32 %v2961_v12, %v901_v33  ;;  %v3074_v4 = vmul.f32 %v2909_v29, %v881_v2 }
 0x165   :  { %v914_v35 = vmul.f32 %v3009_v42, %v2963_v38  ;;  %v3032_v50 = vpop.eup %2069  ;;  %v1069_v2 = vmul.f32 %v1068_v43, %v2863_v23  ;;  %v3100_v45 = vor.u32 1.1754944e-38, %v804_v26  ;;  %vm918_vm3 = vweird.f32 %v2963_v38 }
 0x166   :  { %v3041_v52 = vpop.eup %2071  ;;  %v839_v20 = vmul.f32 %v3032_v50, %v2965_v61  ;;  %2073 = vrcp.f32 %v3038_v48  ;;  %v906_v17 = vsel %vm3087_vm2, %v2961_v12, %v902_v1  ;;  %vm919_vm9 = vweird.f32 %v3009_v42 }
 0x167   :  { %v915_v0 = vsub.f32 1.0, %v914_v35  ;;  %v794_v15 = vmul.f32 %v3041_v52, %v2978_v32  ;;  %v639_v35 = vsub.f32 %v608_v10, %v2441_v16  ;;  %2075 = vrcp.f32 %v3047_v57  ;;  %vm3139_vm5 = vmor %vm918_vm3, %vm919_vm9 }
 0x168   :  { %v840_v33 = vsub.f32 1.0, %v839_v20  ;;  %2077 = vrcp.f32 %v3064_v7  ;;  %v924_v20 = vand.u32 2147483648, %v2963_v38  ;;  %vm3113_vm4 = vcmp.eq.f32.partialorder %v922_v41, 8.507059e+37 }
 0x169   :  { %v624_v51 = vpop.xlane.xlu0 %623  ;;  %v916_v63 = vmul.f32 %v3009_v42, %v915_v0  ;;  %v795_v6 = vsub.f32 1.0, %v794_v15  ;;  %v3102_v10 = vmax.f32 %v639_v35, 1e-08  ;;  %v3105_v0 = vmul.f32 %v2922_v40, %v896_v55 }
 0x16a   :  { %v647_v9 = vsub.f32 %v624_v51, %v2465_v46  ;;  %v841_v62 = vmul.f32 %v3032_v50, %v840_v33  ;;  %v911_v43 = vsel %vm3076_vm1, %v910_v58, %v906_v17  ;;  %v847_v1 = vand.u32 2147483647, %v2965_v61  ;;  %v614_v33 = vpop.xlane.xlu1 %613 }
 0x16b   :  { %v917_v51 = vadd.f32 %v3009_v42, %v916_v63  ;;  %v1071_v15 = vsel %vm1070_vm14, %v2863_v23, %v1069_v2  ;;  %v796_v55 = vmul.f32 %v3041_v52, %v795_v6  ;;  %v849_v63 = vand.u32 2147483648, %v2965_v61 }
 0x16c   :  { %v3095_v49 = vpop.eup %2073  ;;  %v3126_v35 = vmax.f32 %v647_v9, 1e-08  ;;  %2079 = vrcp.f32 %v3102_v10  ;;  %v1074_v41 = vsel %vm1072_vm15, %v1073_v22, %v1071_v15  ;;  %vm844_vm6 = vweird.f32 %v3032_v50 }
 0x16d   :  { %v929_v46 = vmul.f32 %v3095_v49, %v3038_v48  ;;  %v3118_v40 = vpop.eup %2075  ;;  %v789_v16 = vand.u32 2147483648, %v3047_v57  ;;  %1187 = vperm.xlu1 %1949, %v1074_v41   ;;  %v3147_v23 = vmul.f32 %v2920_v30, %v911_v43  ;;  %v921_v22 = vsel %vm3139_vm5, %v3009_v42, %v917_v51 }
 0x16e   :  { %v3133_v44 = vpop.eup %2077  ;;  %2081 = vrcp.f32 %v3126_v35  ;;  %v842_v38 = vadd.f32 %v3032_v50, %v841_v62  ;;  %v779_v9 = vmul.f32 %v3118_v40, %v3047_v57  ;;  %v925_v17 = vor.u32 1.1754944e-38, %v924_v20 }
 0x16f   :  { %v930_v2 = vsub.f32 1.0, %v929_v46  ;;  %vm843_vm7 = vweird.f32 %v2965_v61  ;;  %vm3156_vm8 = vcmp.eq.f32.partialorder %v847_v1, 8.507059e+37  ;;  %v642_v46 = vsub.f32 %v614_v33, %v2469_v47 }
 0x170   :  { %v3162_v30 = vadd.f32 %v3041_v52, %v796_v55  ;;  %v850_v43 = vor.u32 1.1754944e-38, %v849_v63  ;;  %v764_v51 = vmul.f32 %v3133_v44, %v3064_v7  ;;  %v926_v20 = vsel %vm3113_vm4, %v925_v17, %v921_v22  ;;  %vm3171_vm10 = vmor %vm843_vm7, %vm844_vm6 }
 0x171   :  { %v622_v26 = vpop.xlane.xlu0 %621  ;;  %v3175_v62 = vor.u32 1.1754944e-38, %v789_v16  ;;  %v931_v47 = vmul.f32 %v3095_v49, %v930_v2  ;;  %v937_v1 = vand.u32 2147483647, %v3038_v48  ;;  %v846_v55 = vsel %vm3171_vm10, %v3032_v50, %v842_v38 }
 0x172   :  { %v3179_v15 = vpop.eup %2079  ;;  %v780_v12 = vsub.f32 1.0, %v779_v9  ;;  %v646_v63 = vsub.f32 %v622_v26, %v2507_v18  ;;  %2083 = vrsqrt.f32 %v3147_v23  ;;  %vm933_vm11 = vweird.f32 %v3038_v48 }
 0x173   :  { %v939_v58 = vand.u32 2147483648, %v3038_v48  ;;  %v3190_v16 = vmax.f32 %v642_v46, 1e-08  ;;  %v3194_v22 = vmul.f32 %v2935_v36, %v926_v20  ;;  %v765_v50 = vsub.f32 1.0, %v764_v51 }
 0x174   :  { %v3186_v33 = vpop.eup %2081  ;;  %v3198_v26 = vmax.f32 %v646_v63, 1e-08  ;;  %v851_v38 = vsel %vm3156_vm8, %v850_v43, %v846_v55  ;;  %v932_v9 = vadd.f32 %v3095_v49, %v931_v47  ;;  %vm934_vm12 = vweird.f32 %v3095_v49 }
 0x175   :  { %v824_v18 = vmul.f32 %v3186_v33, %v3126_v35  ;;  %v704_v17 = vmul.f32 %v3179_v15, %v3102_v10  ;;  %vm3207_vm13 = vcmp.eq.f32.partialorder %v937_v1, 8.507059e+37  ;;  %v774_v46 = vand.u32 2147483648, %v3064_v7  ;;  %vm3222_vm14 = vmor %vm933_vm11, %vm934_vm12 }
 0x176   :  { %2085 = vrcp.f32 %v3198_v26  ;;  %v940_v51 = vor.u32 1.1754944e-38, %v939_v58  ;;  %v714_v6 = vand.u32 2147483648, %v3102_v10  ;;  %v3218_v61 = vmul.f32 %v2912_v5, %v851_v38 }
 0x177   :  { %2087 = vrcp.f32 %v3190_v16  ;;  %v766_v1 = vmul.f32 %v3133_v44, %v765_v50  ;;  %v936_v63 = vsel %vm3222_vm14, %v3095_v49, %v932_v9  ;;  %v3236_v48 = vor.u32 1.1754944e-38, %v774_v46 }
 0x178   :  { %v2084_v20 = vpop.eup %2083  ;;  %2089 = vrsqrt.f32 %v3194_v22  ;;  %v834_v50 = vand.u32 2147483648, %v3126_v35  ;;  %v3241_v42 = vor.u32 1.1754944e-38, %v714_v6  ;;  %vm799_vm15 = vweird.f32 %v3041_v52 }
 0x179   :  { %v612_v41 = vpop.xlane.xlu0 %611  ;;  %v1100_v58 = vmul.f32 %v2084_v20, %v3147_v23  ;;  %v3255_v6 = vadd.f32 %v3133_v44, %v766_v1  ;;  %vm828_vm0 = vweird.f32 %v3126_v35  ;;  %v759_v36 = vand.u32 2147483648, %v3190_v16 }
 0x17a   :  { %v641_v2 = vsub.f32 %v612_v41, %v2548_v60  ;;  %v781_v60 = vmul.f32 %v3118_v40, %v780_v12  ;;  %v825_v12 = vsub.f32 1.0, %v824_v18  ;;  %v705_v41 = vsub.f32 1.0, %v704_v17 }
 0x17b   :  { %v1101_v49 = vmul.f32 %v2084_v20, %v1100_v58  ;;  %v941_v17 = vsel %vm3207_vm13, %v940_v51, %v936_v63  ;;  %vm798_vm2 = vweird.f32 %v2978_v32  ;;  %vm829_vm3 = vweird.f32 %v3186_v33 }
 0x17c   :  { %v3215_v43 = vmax.f32 %v641_v2, 1e-08  ;;  %v3234_v5 = vadd.f32 %v3118_v40, %v781_v60  ;;  %v832_v2 = vand.u32 2147483647, %v3126_v35  ;;  %v3244_v9 = vpop.eup %2085  ;;  %v826_v60 = vmul.f32 %v3186_v33, %v825_v12  ;;  %vm3294_vm6 = vmor %vm828_vm0, %vm829_vm3 }
 0x17d   :  { %v3251_v47 = vpop.eup %2087  ;;  %v706_v58 = vmul.f32 %v3179_v15, %v705_v41  ;;  %v809_v12 = vmul.f32 %v3244_v9, %v3198_v26  ;;  %v1102_v63 = vmul.f32 0.5, %v1101_v49  ;;  %v3268_v1 = vmul.f32 %v2953_v8, %v941_v17  ;;  %vm3328_vm13 = vmor %vm798_vm2, %vm799_vm15 }
 0x17e   :  { %2091 = vrcp.f32 %v3215_v43  ;;  %vm3260_vm1 = vcmp.eq.f32.partialorder %v832_v2, 8.507059e+37  ;;  %vm769_vm9 = vweird.f32 %v3133_v44  ;;  %v827_v2 = vadd.f32 %v3186_v33, %v826_v60 }
 0x17f   :  { %2093 = vrsqrt.f32 %v3218_v61  ;;  %v1103_v49 = vsub.f32 1.5, %v1102_v63  ;;  %v3282_v8 = vadd.f32 %v3179_v15, %v706_v58  ;;  %v3284_v17 = vor.u32 1.1754944e-38, %v759_v36 }
 0x180   :  { %vm1106_vm4 = vcmp.eq.f32.partialorder %v3147_v23, inf  ;;  %vm768_vm5 = vweird.f32 %v3064_v7  ;;  %v810_v60 = vsub.f32 1.0, %v809_v12  ;;  %vm1108_vm7 = vcmp.eq.f32.partialorder %v3147_v23, 0.0 }
 0x181   :  { %v610_v38 = vpop.xlane.xlu0 %609  ;;  %v1104_v34 = vmul.f32 %v2084_v20, %v1103_v49  ;;  %v1109_v59 = vand.u32 2147483648, %v3147_v23  ;;  %v831_v20 = vsel %vm3294_vm6, %v3186_v33, %v827_v2  ;;  %vm813_vm8 = vweird.f32 %v3198_v26  ;;  %vm3350_vm0 = vmor %vm768_vm5, %vm769_vm9 }
 0x182   :  { %v640_v46 = vsub.f32 %v610_v38, %v2588_v3  ;;  %v835_v3 = vor.u32 1.1754944e-38, %v834_v50  ;;  %v2090_v38 = vpop.eup %2089  ;;  %v749_v50 = vmul.f32 %v3251_v47, %v3190_v16  ;;  %vm784_vm10 = vweird.f32 %v3118_v40 }
 0x183   :  { %v1112_v55 = vmul.f32 %v2090_v38, %v3194_v22  ;;  %v1105_v35 = vmul.f32 %v1104_v34, %v3147_v23  ;;  %v742_v37 = vand.u32 2147483647, %v3215_v43  ;;  %v744_v53 = vand.u32 2147483648, %v3215_v43 }
 0x184   :  { %v3272_v18 = vmax.f32 %v640_v46, 1e-08  ;;  %v3279_v29 = vpop.eup %2091  ;;  %v819_v46 = vand.u32 2147483648, %v3198_v26  ;;  %v811_v54 = vmul.f32 %v3244_v9, %v810_v60  ;;  %vm783_vm11 = vweird.f32 %v3047_v57 }
 0x185   :  { %v2094_v41 = vpop.eup %2093  ;;  %v1113_v63 = vmul.f32 %v2090_v38, %v1112_v55  ;;  %v750_v55 = vsub.f32 1.0, %v749_v50  ;;  %v734_v36 = vmul.f32 %v3279_v29, %v3215_v43  ;;  %v1107_v33 = vsel %vm1106_vm4, %v3147_v23, %v1105_v35 }
 0x186   :  { %2095 = vrcp.f32 %v3272_v18  ;;  %v1052_v12 = vmul.f32 %v2094_v41, %v3218_v61  ;;  %v820_v58 = vor.u32 1.1754944e-38, %v819_v46  ;;  %v836_v34 = vsel %vm3260_vm1, %v835_v3, %v831_v20 }
 0x187   :  { %v1114_v49 = vmul.f32 0.5, %v1113_v63  ;;  %v1110_v50 = vsel %vm1108_vm7, %v1109_v59, %v1107_v33  ;;  %vm1118_vm12 = vcmp.eq.f32.partialorder %v3194_v22, inf  ;;  %v751_v60 = vmul.f32 %v3251_v47, %v750_v55 }
 0x188   :  { %v1053_v13 = vmul.f32 %v2094_v41, %v1052_v12  ;;  %1202 = vperm.xlu1 %1949, %v1110_v50   ;;  %vm1120_vm14 = vcmp.eq.f32.partialorder %v3194_v22, 0.0  ;;  %v1121_v59 = vand.u32 2147483648, %v3194_v22  ;;  %v735_v23 = vsub.f32 1.0, %v734_v36 }
 0x189   :  { %v1115_v2 = vsub.f32 1.5, %v1114_v49  ;;  %v801_v3 = vsel %vm3328_vm13, %v3041_v52, %v3162_v30  ;;  %2097 = vrsqrt.f32 %v3074_v4  ;;  %v3341_v20 = vmul.f32 %v2674_v28, %v836_v34 }
 0x18a   :  { %v1054_v63 = vmul.f32 0.5, %v1053_v13  ;;  %v812_v55 = vadd.f32 %v3244_v9, %v811_v54  ;;  %vm814_vm15 = vweird.f32 %v3244_v9  ;;  %vm1058_vm1 = vcmp.eq.f32.partialorder %v3218_v61, inf }
 0x18b   :  { %v1116_v51 = vmul.f32 %v2090_v38, %v1115_v2  ;;  %v3933_v28 = vand.u32 2147483647, %v2978_v32  ;;  %vm754_vm3 = vweird.f32 %v3251_v47  ;;  %vm738_vm4 = vweird.f32 %v3215_v43  ;;  %vm3372_vm5 = vmor %vm813_vm8, %vm814_vm15 }
 0x18c   :  { %v3322_v12 = vpop.eup %2095  ;;  %v1055_v13 = vsub.f32 1.5, %v1054_v63  ;;  %vm1060_vm9 = vcmp.eq.f32.partialorder %v3218_v61, 0.0  ;;  %v736_v49 = vmul.f32 %v3279_v29, %v735_v23  ;;  %vm753_vm6 = vweird.f32 %v3190_v16  ;;  %vm3400_vm8 = vmor %vm783_vm11, %vm784_vm10 }
 0x18d   :  { %v1117_v38 = vmul.f32 %v1116_v51, %v3194_v22  ;;  %v719_v52 = vmul.f32 %v3322_v12, %v3272_v18  ;;  %vm803_vm2 = vcmp.eq.f32.partialorder %v3933_v28, 8.507059e+37  ;;  %v729_v34 = vand.u32 2147483648, %v3272_v18 }
 0x18e   :  { %v1056_v30 = vmul.f32 %v2094_v41, %v1055_v13  ;;  %v806_v35 = vsel %vm803_vm2, %v3100_v45, %v801_v3  ;;  %v771_v41 = vsel %vm3350_vm0, %v3133_v44, %v3255_v6  ;;  %v1061_v45 = vand.u32 2147483648, %v3218_v61 }
 0x18f   :  { %v1119_v54 = vsel %vm1118_vm12, %v3194_v22, %v1117_v38  ;;  %v816_v44 = vsel %vm3372_vm5, %v3244_v9, %v812_v55  ;;  %v3936_v6 = vand.u32 2147483647, %v3064_v7  ;;  %2099 = vrsqrt.f32 %v3341_v20  ;;  %v2098_v50 = vpop.eup %2097 }
 0x190   :  { %v1122_v33 = vsel %vm1120_vm14, %v1121_v59, %v1119_v54  ;;  %v1057_v2 = vmul.f32 %v1056_v30, %v3218_v61  ;;  %v720_v22 = vsub.f32 1.0, %v719_v52  ;;  %v3393_v46 = vmul.f32 %v3020_v24, %v806_v35 }
 0x191   :  { %vm773_vm7 = vcmp.eq.f32.partialorder %v3936_v6, 8.507059e+37  ;;  %1207 = vperm.xlu1 %1949, %v1122_v33   ;;  %v3939_v59 = vand.u32 2147483647, %v3198_v26  ;;  %v1076_v24 = vmul.f32 %v2098_v50, %v3074_v4  ;;  %2101 = vrsqrt.f32 %v3105_v0 }
 0x192   :  { %v1059_v63 = vsel %vm1058_vm1, %v3218_v61, %v1057_v2  ;;  %v776_v51 = vsel %vm773_vm7, %v3236_v48, %v771_v41  ;;  %v752_v48 = vadd.f32 %v3251_v47, %v751_v60  ;;  %v745_v23 = vor.u32 1.1754944e-38, %v744_v53 }
 0x193   :  { %v1062_v9 = vsel %vm1060_vm9, %v1061_v45, %v1059_v63  ;;  %vm818_vm12 = vcmp.eq.f32.partialorder %v3939_v59, 8.507059e+37  ;;  %v786_v3 = vsel %vm3400_vm8, %v3118_v40, %v3234_v5  ;;  %vm709_vm10 = vweird.f32 %v3179_v15 }
 0x194   :  { %1182 = vperm.xlu2 %1960, %v1062_v9   ;;  %v821_v13 = vsel %vm818_vm12, %v820_v58, %v816_v44  ;;  %v737_v61 = vadd.f32 %v3279_v29, %v736_v49  ;;  %vm739_vm11 = vweird.f32 %v3279_v29  ;;  %v1077_v26 = vmul.f32 %v2098_v50, %v1076_v24 }
 0x195   :  { %v3419_v55 = vmul.f32 %v2974_v56, %v776_v51  ;;  %v721_v60 = vmul.f32 %v3322_v12, %v720_v22  ;;  %v727_v53 = vand.u32 2147483647, %v3272_v18  ;;  %v3940_v58 = vand.u32 2147483647, %v3047_v57  ;;  %v2100_v40 = vpop.eup %2099  ;;  %vm3435_vm15 = vmor %vm738_vm4, %vm739_vm11 }
 0x196   :  { %2103 = vrsqrt.f32 %v3393_v46  ;;  %vm708_vm14 = vweird.f32 %v3102_v10  ;;  %v3427_v5 = vor.u32 1.1754944e-38, %v729_v34  ;;  %v3430_v38 = vmul.f32 %v2939_v21, %v821_v13  ;;  %vm3453_vm4 = vmor %vm753_vm6, %vm754_vm3 }
 0x197   :  { %vm788_vm13 = vcmp.eq.f32.partialorder %v3940_v58, 8.507059e+37  ;;  %v1078_v36 = vmul.f32 0.5, %v1077_v26  ;;  %vm1082_vm0 = vcmp.eq.f32.partialorder %v3074_v4, inf  ;;  %vm1084_vm1 = vcmp.eq.f32.partialorder %v3074_v4, 0.0  ;;  %v2102_v30 = vpop.eup %2101  ;;  %vm3496_vm11 = vmor %vm708_vm14, %vm709_vm10 }
 0x198   :  { %v791_v56 = vsel %vm788_vm13, %v3175_v62, %v786_v3  ;;  %v1040_v57 = vmul.f32 %v2100_v40, %v3341_v20  ;;  %2105 = vrsqrt.f32 %v3268_v1  ;;  %vm724_vm2 = vweird.f32 %v3322_v12 }
 0x199   :  { %v1079_v21 = vsub.f32 1.5, %v1078_v36  ;;  %v1085_v62 = vand.u32 2147483648, %v3074_v4  ;;  %v741_v28 = vsel %vm3435_vm15, %v3279_v29, %v737_v61  ;;  %2107 = vrsqrt.f32 %v3419_v55 }
 0x19a   :  { %v3458_v35 = vadd.f32 %v3322_v12, %v721_v60  ;;  %v3461_v41 = vmul.f32 %v2984_v14, %v791_v56  ;;  %v1041_v32 = vmul.f32 %v2100_v40, %v1040_v57  ;;  %v1088_v49 = vmul.f32 %v2102_v30, %v3105_v0 }
 0x19b   :  { %vm723_vm9 = vweird.f32 %v3272_v18  ;;  %v3945_v29 = vpack.i.bf16 %v2857_v27, %v2937_v31  ;;  %v1080_v33 = vmul.f32 %v2098_v50, %v1079_v21  ;;  %vm1046_vm3 = vcmp.eq.f32.partialorder %v3341_v20, inf }
 0x19c   :  { %vm743_vm5 = vcmp.eq.f32.partialorder %v742_v37, 8.507059e+37  ;;  %v756_v14 = vsel %vm3453_vm4, %v3251_v47, %v752_v48  ;;  %2109 = vrsqrt.f32 %v3430_v38  ;;  %v2104_v2 = vpop.eup %2103  ;;  %v1042_v45 = vmul.f32 0.5, %v1041_v32  ;;  %vm3522_vm13 = vmor %vm723_vm9, %vm724_vm2 }
 0x19d   :  { %1973 = vperm.xlu1 %1949, %v3945_v29   ;;  %vm1048_vm6 = vcmp.eq.f32.partialorder %v3341_v20, 0.0  ;;  %v1049_v34 = vand.u32 2147483648, %v3341_v20  ;;  %v1089_v27 = vmul.f32 %v2102_v30, %v1088_v49  ;;  %v746_v31 = vsel %vm743_vm5, %v745_v23, %v741_v28 }
 0x19e   :  { %v1081_v44 = vmul.f32 %v1080_v33, %v3074_v4  ;;  %vm1094_vm7 = vcmp.eq.f32.partialorder %v3105_v0, inf  ;;  %v3946_v37 = vand.u32 2147483647, %v3190_v16  ;;  %v1016_v43 = vmul.f32 %v2104_v2, %v3393_v46  ;;  %v2106_v47 = vpop.eup %2105 }
 0x19f   :  { %v1043_v6 = vsub.f32 1.5, %v1042_v45  ;;  %v1090_v50 = vmul.f32 0.5, %v1089_v27  ;;  %v1097_v22 = vand.u32 2147483648, %v3105_v0  ;;  %v2108_v51 = vpop.eup %2107  ;;  %vm1096_vm12 = vcmp.eq.f32.partialorder %v3105_v0, 0.0  ;;  %v3954_v27 = vld [vmem:[#allocation33_spill] sm:$0xff] }
 0x1a0   :  { %vm758_vm8 = vcmp.eq.f32.partialorder %v3946_v37, 8.507059e+37  ;;  %v1083_v7 = vsel %vm1082_vm0, %v3074_v4, %v1081_v44  ;;  %v3489_v9 = vmul.f32 %v2969_v39, %v746_v31  ;;  %v1017_v16 = vmul.f32 %v2104_v2, %v1016_v43  ;;  %v3955_v44 = vld [vmem:[#allocation30_spill] sm:$0xff]  ;;  %v3956_v37 = vld [vmem:[#allocation29_spill] sm:$0xff] }
 0x1a1   :  { %v761_v63 = vsel %vm758_vm8, %v3284_v17, %v756_v14  ;;  %v1124_v59 = vmul.f32 %v2106_v47, %v3268_v1  ;;  %v1086_v17 = vsel %vm1084_vm1, %v1085_v62, %v1083_v7  ;;  %v1044_v48 = vmul.f32 %v2100_v40, %v1043_v6 }
 0x1a2   :  { %v1091_v23 = vsub.f32 1.5, %v1090_v50  ;;  %v992_v13 = vmul.f32 %v2108_v51, %v3419_v55  ;;  %v2110_v39 = vpop.eup %2109  ;;  %1192 = vperm.xlu2 %1960, %v1086_v17   ;;  %v3504_v3 = vmul.f32 %v2986_v11, %v761_v63  ;;  %v1018_v61 = vmul.f32 0.5, %v1017_v16 }
 0x1a3   :  { %v1125_v26 = vmul.f32 %v2106_v47, %v1124_v59  ;;  %v711_v60 = vsel %vm3496_vm11, %v3179_v15, %v3282_v8  ;;  %v1045_v58 = vmul.f32 %v1044_v48, %v3341_v20  ;;  %v1028_v40 = vmul.f32 %v2110_v39, %v3430_v38 }
 0x1a4   :  { %v1092_v4 = vmul.f32 %v2102_v30, %v1091_v23  ;;  %v993_v36 = vmul.f32 %v2108_v51, %v992_v13  ;;  %v3949_v56 = vpack.i.bf16 %v2929_v19, %v2916_v25  ;;  %v1019_v52 = vsub.f32 1.5, %v1018_v61  ;;  %v3958_v61 = vld [vmem:[#allocation31_spill] sm:$0xff] }
 0x1a5   :  { %v1126_v11 = vmul.f32 0.5, %v1125_v26  ;;  %v3950_v57 = vand.u32 2147483647, %v3102_v10  ;;  %2111 = vrsqrt.f32 %v3489_v9  ;;  %v1047_v25 = vsel %vm1046_vm3, %v3341_v20, %v1045_v58  ;;  %v3959_v26 = vld [vmem:[#allocation32_spill] sm:$0xff] }
 0x1a6   :  { %1978 = vperm.xlu1 %1949, %v3949_v56   ;;  %v1093_v19 = vmul.f32 %v1092_v4, %v3105_v0  ;;  %v994_v8 = vmul.f32 0.5, %v993_v36  ;;  %v1029_v30 = vmul.f32 %v2110_v39, %v1028_v40  ;;  %v1050_v10 = vsel %vm1048_vm6, %v1049_v34, %v1047_v25 }
 0x1a7   :  { %vm713_vm10 = vcmp.eq.f32.partialorder %v3950_v57, 8.507059e+37  ;;  %v1020_v21 = vmul.f32 %v2104_v2, %v1019_v52  ;;  %v1127_v62 = vsub.f32 1.5, %v1126_v11  ;;  %v726_v28 = vsel %vm3522_vm13, %v3322_v12, %v3458_v35  ;;  %1177 = vperm.xlu0 %1966, %v1050_v10   ;;  %v3953_v35 = vld [vmem:[#allocation34_spill] sm:$0xff] }
 0x1a8   :  { %v1095_v54 = vsel %vm1094_vm7, %v3105_v0, %v1093_v19  ;;  %v995_v32 = vsub.f32 1.5, %v994_v8  ;;  %v1030_v49 = vmul.f32 0.5, %v1029_v30  ;;  %v716_v29 = vsel %vm713_vm10, %v3241_v42, %v711_v60 }
 0x1a9   :  { %v1021_v33 = vmul.f32 %v1020_v21, %v3393_v46  ;;  %v1128_v20 = vmul.f32 %v2106_v47, %v1127_v62  ;;  %vm728_vm14 = vcmp.eq.f32.partialorder %v727_v53, 8.507059e+37  ;;  %2113 = vrsqrt.f32 %v3461_v41 }
 0x1aa   :  { %v1098_v12 = vsel %vm1096_vm12, %v1097_v22, %v1095_v54  ;;  %vm1022_vm15 = vcmp.eq.f32.partialorder %v3393_v46, inf  ;;  %v1853_v14 = vadd.f32 -1.0, %v3953_v35  ;;  %v731_v2 = vsel %vm728_vm14, %v3427_v5, %v726_v28 }
 0x1ab   :  { %v2112_v45 = vpop.eup %2111  ;;  %1197 = vperm.xlu2 %1960, %v1098_v12   ;;  %v1129_v42 = vmul.f32 %v1128_v20, %v3268_v1  ;;  %v1031_v34 = vsub.f32 1.5, %v1030_v49  ;;  %v3551_v31 = vmul.f32 %v3954_v27, %v716_v29  ;;  %2115 = vrsqrt.f32 %v3504_v3 }
 0x1ac   :  { %v1023_v18 = vsel %vm1022_vm15, %v3393_v46, %v1021_v33  ;;  %v996_v0 = vmul.f32 %v2108_v51, %v995_v32  ;;  %v968_v53 = vmul.f32 %v2112_v45, %v3489_v9  ;;  %v3957_v43 = vpack.i.bf16 %v3955_v44, %v3956_v37 }
 0x1ad   :  { %v1025_v5 = vand.u32 2147483648, %v3393_v46  ;;  %v3560_v47 = vmul.f32 %v1853_v14, %v731_v2  ;;  %vm1024_vm0 = vcmp.eq.f32.partialorder %v3393_v46, 0.0  ;;  %vm1130_vm1 = vcmp.eq.f32.partialorder %v3268_v1, inf }
 0x1ae   :  { %1983 = vperm.xlu1 %1949, %v3957_v43   ;;  %v969_v6 = vmul.f32 %v2112_v45, %v968_v53  ;;  %v1131_v63 = vsel %vm1130_vm1, %v3268_v1, %v1129_v42  ;;  %v1032_v51 = vmul.f32 %v2110_v39, %v1031_v34  ;;  %2117 = vrsqrt.f32 %v3551_v31 }
 0x1af   :  { %v2114_v50 = vpop.eup %2113  ;;  %v1026_v22 = vsel %vm1024_vm0, %v1025_v5, %v1023_v18  ;;  %v1133_v7 = vand.u32 2147483648, %v3268_v1  ;;  %v997_v16 = vmul.f32 %v996_v0, %v3419_v55  ;;  %vm1132_vm2 = vcmp.eq.f32.partialorder %v3268_v1, 0.0 }
 0x1b0   :  { %1167 = vperm.xlu0 %1966, %v1026_v22   ;;  %v970_v59 = vmul.f32 0.5, %v969_v6  ;;  %v1004_v24 = vmul.f32 %v2114_v50, %v3461_v41  ;;  %2119 = vrsqrt.f32 %v3560_v47  ;;  %vm998_vm4 = vcmp.eq.f32.partialorder %v3419_v55, inf  ;;  %v1952_v22 = vpop.permute.xlu1 %1951 }
 0x1b1   :  { %v2116_v17 = vpop.eup %2115  ;;  %v1134_v46 = vsel %vm1132_vm2, %v1133_v7, %v1131_v63  ;;  %v1033_v39 = vmul.f32 %v1032_v51, %v3430_v38  ;;  %v1987_v60 = vpack.i.bf16 %v3959_v26, %v3958_v61  ;;  %v999_v58 = vsel %vm998_vm4, %v3419_v55, %v997_v16  ;;  %v1963_v63 = vpop.permute.xlu2 %1962 }
 0x1b2   :  { %v971_v48 = vsub.f32 1.5, %v970_v59  ;;  %v1005_v23 = vmul.f32 %v2114_v50, %v1004_v24  ;;  %v980_v13 = vmul.f32 %v2116_v17, %v3504_v3  ;;  %v1001_v56 = vand.u32 2147483648, %v3419_v55 }
 0x1b3   :  { %1212 = vperm.xlu2 %1960, %v1134_v46   ;;  %vm1000_vm9 = vcmp.eq.f32.partialorder %v3419_v55, 0.0  ;;  %vm1034_vm3 = vcmp.eq.f32.partialorder %v3430_v38, inf  ;;  %v1037_v8 = vand.u32 2147483648, %v3430_v38  ;;  %vm1036_vm5 = vcmp.eq.f32.partialorder %v3430_v38, 0.0 }
 0x1b4   :  { %v972_v4 = vmul.f32 %v2112_v45, %v971_v48  ;;  %v1006_v36 = vmul.f32 0.5, %v1005_v23  ;;  %v981_v1 = vmul.f32 %v2116_v17, %v980_v13  ;;  %v2118_v40 = vpop.eup %2117  ;;  %v1002_v15 = vsel %vm1000_vm9, %v1001_v56, %v999_v58  ;;  %v1969_v48 = vpop.permute.xlu0 %1968  ;;  %v3960_v13 = vld [vmem:[#allocation23_spill] sm:$0xff] }
 0x1b5   :  { %v944_v11 = vmul.f32 %v2118_v40, %v3551_v31  ;;  %v1035_v25 = vsel %vm1034_vm3, %v3430_v38, %v1033_v39  ;;  %vm974_vm6 = vcmp.eq.f32.partialorder %v3489_v9, inf  ;;  %v977_v20 = vand.u32 2147483648, %v3489_v9 }
 0x1b6   :  { %1988 = vperm.xlu1 %1949, %v1987_v60   ;;  %v1007_v52 = vsub.f32 1.5, %v1006_v36  ;;  %v2120_v57 = vpop.eup %2119  ;;  %v982_v19 = vmul.f32 0.5, %v981_v1  ;;  %v973_v30 = vmul.f32 %v972_v4, %v3489_v9  ;;  %v1038_v62 = vsel %vm1036_vm5, %v1037_v8, %v1035_v25  ;;  %v3961_v60 = vld [vmem:[#allocation20_spill] sm:$0xff]  ;;  %v3962_v4 = vld [vmem:[#allocation17_spill] sm:$0xff] }
 0x1b7   :  { %v945_v21 = vmul.f32 %v2118_v40, %v944_v11  ;;  %v956_v55 = vmul.f32 %v2120_v57, %v3560_v47  ;;  %vm976_vm7 = vcmp.eq.f32.partialorder %v3489_v9, 0.0  ;;  %vm1010_vm8 = vcmp.eq.f32.partialorder %v3461_v41, inf  ;;  %v3963_v1 = vld [vmem:[#allocation25_spill] sm:$0xff]  ;;  %v3964_v25 = vld [vmem:[#allocation16_spill] sm:$0xff] }
 0x1b8   :  { %1157 = vperm.xlu0 %1966, %v1002_v15   ;;  %v1008_v10 = vmul.f32 %v2114_v50, %v1007_v52  ;;  %v983_v32 = vsub.f32 1.5, %v982_v19  ;;  %v975_v29 = vsel %vm974_vm6, %v3489_v9, %v973_v30  ;;  %v1013_v45 = vand.u32 2147483648, %v3461_v41  ;;  %v1957_v51 = vpop.permute.xlu1 %1956 }
 0x1b9   :  { %v946_v28 = vmul.f32 0.5, %v945_v21  ;;  %v957_v49 = vmul.f32 %v2120_v57, %v956_v55  ;;  %v978_v12 = vsel %vm976_vm7, %v977_v20, %v975_v29  ;;  %vm1012_vm12 = vcmp.eq.f32.partialorder %v3461_v41, 0.0  ;;  %v3965_v21 = vld [vmem:[#allocation15_spill] sm:$0xff] }
 0x1ba   :  { %v1009_v54 = vmul.f32 %v1008_v10, %v3461_v41  ;;  %v984_v14 = vmul.f32 %v2116_v17, %v983_v32  ;;  %vm950_vm11 = vcmp.eq.f32.partialorder %v3551_v31, inf  ;;  %v953_v0 = vand.u32 2147483648, %v3551_v31 }
 0x1bb   :  { %1172 = vperm.xlu2 %1960, %v1038_v62   ;;  %v947_v33 = vsub.f32 1.5, %v946_v28  ;;  %v958_v2 = vmul.f32 0.5, %v957_v49  ;;  %vm986_vm10 = vcmp.eq.f32.partialorder %v3504_v3, inf  ;;  %vm952_vm13 = vcmp.eq.f32.partialorder %v3551_v31, 0.0 }
 0x1bc   :  { %v1011_v35 = vsel %vm1010_vm8, %v3461_v41, %v1009_v54  ;;  %v985_v27 = vmul.f32 %v984_v14, %v3504_v3  ;;  %v989_v41 = vand.u32 2147483648, %v3504_v3  ;;  %vm988_vm14 = vcmp.eq.f32.partialorder %v3504_v3, 0.0 }
 0x1bd   :  { %v948_v38 = vmul.f32 %v2118_v40, %v947_v33  ;;  %v1014_v34 = vsel %vm1012_vm12, %v1013_v45, %v1011_v35  ;;  %v959_v9 = vsub.f32 1.5, %v958_v2  ;;  %vm962_vm15 = vcmp.eq.f32.partialorder %v3560_v47, inf  ;;  %v3966_v33 = vld [vmem:[#allocation19_spill] sm:$0xff]  ;;  %v3967_v2 = vld [vmem:[#allocation18_spill] sm:$0xff] }
 0x1be   :  { %v987_v53 = vsel %vm986_vm10, %v3504_v3, %v985_v27  ;;  %v965_v50 = vand.u32 2147483648, %v3560_v47  ;;  %vm964_vm0 = vcmp.eq.f32.partialorder %v3560_v47, 0.0  ;;  %v251_v17 = vlaneseq }
 0x1bf   :  { %v949_v42 = vmul.f32 %v948_v38, %v3551_v31  ;;  %v960_v37 = vmul.f32 %v2120_v57, %v959_v9  ;;  %v990_v43 = vsel %vm988_vm14, %v989_v41, %v987_v53  ;;  %v1970_v61 = vunpack.i.l.bf16 %v1969_v48 }
 0x1c0   :  { %1147 = vperm.xlu0 %1966, %v978_v12   ;;  %v3610_v23 = vand.u32 127, %v251_v17  ;;  %v1971_v26 = vunpack.i.h.bf16 %v1969_v48  ;;  %v1965_v52 = vunpack.i.h.bf16 %v1963_v63  ;;  %v1964_v11 = vunpack.i.l.bf16 %v1963_v63  ;;  %v3970_v63 = vld [vmem:[#allocation22_spill] sm:$0xff] }
 0x1c1   :  { %v951_v18 = vsel %vm950_vm11, %v3551_v31, %v949_v42  ;;  %v961_v5 = vmul.f32 %v960_v37, %v3560_v47  ;;  %v1954_v10 = vunpack.i.h.bf16 %v1952_v22  ;;  %v1953_v28 = vunpack.i.l.bf16 %v1952_v22 }
 0x1c2   :  { %v954_v44 = vsel %vm952_vm13, %v953_v0, %v951_v18  ;;  %vm253_vm1 = vcmp.eq.s32.totalorder %v3610_v23, 0  ;;  %v1959_v35 = vunpack.i.h.bf16 %v1957_v51  ;;  %v1958_v14 = vunpack.i.l.bf16 %v1957_v51  ;;  %v3968_v18 = vld [vmem:[#allocation28_spill] sm:$0xff] }
 0x1c3   :  { %1162 = vperm.xlu2 %1960, %v1014_v34   ;;  %v963_v6 = vsel %vm962_vm15, %v3560_v47, %v961_v5 }
 0x1c4   :  { %v966_v31 = vsel %vm964_vm0, %v965_v50, %v963_v6 }
 0x1c8   :  { %1137 = vperm.xlu0 %1966, %v954_v44  }
 0x1cb   :  { %1152 = vperm.xlu2 %1960, %v990_v43   ;;  %v3969_v43 = vld [vmem:[#allocation21_spill] sm:$0xff] }
 0x1d3   :  { %1142 = vperm.xlu2 %1960, %v966_v31  }
 0x1df   :  { %v1188_v16 = vpop.permute.xlu1 %1187 }
 0x1e0   :  { %v1225_v55 = vmul.f32 %v1188_v16, %v3965_v21 }
 0x1e2   :  { %v1321_v29 = vsel %vm253_vm1, %v1953_v28, %v1225_v55  ;;  %v1920_v28 = vld [vmem:[#allocation8 + $0x20] sm:$0xff] }
 0x1ee   :  { %v1183_v7 = vpop.permute.xlu2 %1182 }
 0x1ef   :  { %v1224_v20 = vmul.f32 %v1183_v7, %v3966_v33  ;;  %v1919_v33 = vld [vmem:[#allocation8 + $0x18] sm:$0xff] }
 0x1f1   :  { %v1320_v34 = vsel %vm253_vm1, %v1959_v35, %v1224_v20  ;;  %v1923_v20 = vld [vmem:[#allocation8 + $0x38] sm:$0xff] }
 0x1fa   :  { %v1203_v59 = vpop.permute.xlu1 %1202 }
 0x1fb   :  { %v1228_v58 = vmul.f32 %v1203_v59, %v3961_v60 }
 0x1fc   :  { %v1193_v3 = vpop.permute.xlu2 %1192 }
 0x1fd   :  { %v1226_v19 = vmul.f32 %v1193_v3, %v3964_v25  ;;  %v1324_v30 = vsel %vm253_vm1, %v1965_v52, %v1228_v58  ;;  %v3971_v3 = vld [vmem:[#allocation24_spill] sm:$0xff]  ;;  %v3973_v58 = vld [vmem:[#allocation14_spill] sm:$0xff] }
 0x1ff   :  { %v1322_v54 = vsel %vm253_vm1, %v1954_v10, %v1226_v19 }
 0x200   :  { %v1332_v38 = vpack.c.bf16 %v1322_v54, %v1321_v29  ;;  %v1917_v54 = vld [vmem:[#allocation8 + $0x8] sm:$0xff]  ;;  %v1922_v29 = vld [vmem:[#allocation8 + $0x30] sm:$0xff] }
 0x203   :  { %v1208_v46 = vpop.permute.xlu1 %1207 }
 0x204   :  { %v1229_v39 = vmul.f32 %v1208_v46, %v3960_v13 }
 0x205   :  { %v1198_v24 = vpop.permute.xlu2 %1197 }
 0x206   :  { %v1227_v36 = vmul.f32 %v1198_v24, %v3962_v4  ;;  %v1325_v56 = vsel %vm253_vm1, %v1970_v61, %v1229_v39  ;;  %v3972_v61 = vld [vmem:[#allocation27_spill] sm:$0xff] }
 0x208   :  { %v1323_v8 = vsel %vm253_vm1, %v1964_v11, %v1227_v36  ;;  %v3974_v11 = vld [vmem:[#allocation13_spill] sm:$0xff] }
 0x209   :  { %v1333_v62 = vpack.c.bf16 %v1324_v30, %v1323_v8  ;;  %v3975_v8 = vld [vmem:[#allocation26_spill] sm:$0xff] }
 0x20d   :  { %v1213_v47 = vpop.permute.xlu2 %1212 }
 0x20e   :  { %v1230_v40 = vmul.f32 %v1213_v47, %v3963_v1 }
 0x20f   :  { %v1974_v32 = vpop.permute.xlu1 %1973 }
 0x210   :  { %v1326_v57 = vsel %vm253_vm1, %v1971_v26, %v1230_v40  ;;  %v1976_v9 = vunpack.i.h.bf16 %v1974_v32  ;;  %v1975_v41 = vunpack.i.l.bf16 %v1974_v32  ;;  %v1921_v32 = vld [vmem:[#allocation8 + $0x28] sm:$0xff] }
 0x211   :  { %v1334_v15 = vpack.c.bf16 %v1326_v57, %v1325_v56 }
 0x213   :  { %1399 = vmatpush.bf16.msra.mxu1 %v1334_v15  ;;  %1932 = vmatpush.bf16.msra.mxu3 %v1334_v15 }
 0x215   :  { %v1173_v49 = vpop.permute.xlu2 %1172 }
 0x216   :  { %v1222_v0 = vmul.f32 %v1173_v49, %v3968_v18  ;;  %v1918_v49 = vld [vmem:[#allocation8 + $0x10] sm:$0xff] }
 0x217   :  { %1400 = vmatpush.bf16.msra.mxu1 %v1333_v62  ;;  %1933 = vmatpush.bf16.msra.mxu3 %v1333_v62  ;;  %v1916_v62 = vld [vmem:[#allocation8] sm:$0xff] }
 0x218   :  { %v1979_v53 = vpop.permute.xlu1 %1978  ;;  %v1318_v50 = vsel %vm253_vm1, %v1976_v9, %v1222_v0 }
 0x219   :  { %v1178_v12 = vpop.permute.xlu0 %1177  ;;  %v1981_v22 = vunpack.i.h.bf16 %v1979_v53  ;;  %v1980_v16 = vunpack.i.l.bf16 %v1979_v53 }
 0x21a   :  { %v1223_v45 = vmul.f32 %v1178_v12, %v3967_v2 }
 0x21b   :  { %1401 = vmatpush.bf16.msra.mxu1 %v1332_v38  ;;  %1934 = vmatpush.bf16.msra.mxu3 %v1332_v38 }
 0x21c   :  { %v1319_v42 = vsel %vm253_vm1, %v1958_v14, %v1223_v45 }
 0x21d   :  { %v1331_v27 = vpack.c.bf16 %v1320_v34, %v1319_v42  ;;  %v1163_v44 = vpop.permute.xlu2 %1162 }
 0x21e   :  { %v1220_v51 = vmul.f32 %v1163_v44, %v3970_v63 }
 0x21f   :  { %1402 = vmatpush.bf16.msra.mxu1 %v1331_v27  ;;  %1935 = vmatpush.bf16.msra.mxu3 %v1331_v27 }
 0x220   :  { %v1984_v24 = vpop.permute.xlu1 %1983  ;;  %v1316_v48 = vsel %vm253_vm1, %v1981_v22, %v1220_v51 }
 0x221   :  { %v1986_v39 = vunpack.i.h.bf16 %v1984_v24  ;;  %v1985_v60 = vunpack.i.l.bf16 %v1984_v24 }
 0x222   :  { %v1168_v37 = vpop.permute.xlu0 %1167 }
 0x223   :  { %v1221_v5 = vmul.f32 %v1168_v37, %v3969_v43 }
 0x225   :  { %v1317_v6 = vsel %vm253_vm1, %v1975_v41, %v1221_v5  ;;  %v1153_v17 = vpop.permute.xlu2 %1152 }
 0x226   :  { %v1330_v31 = vpack.c.bf16 %v1318_v50, %v1317_v6  ;;  %v1218_v26 = vmul.f32 %v1153_v17, %v3972_v61 }
 0x228   :  { %1403 = vmatpush.bf16.msra.mxu1 %v1330_v31  ;;  %1936 = vmatpush.bf16.msra.mxu3 %v1330_v31  ;;  %v1314_v1 = vsel %vm253_vm1, %v1986_v39, %v1218_v26  ;;  %v1989_v56 = vpop.permute.xlu1 %1988 }
 0x229   :  { %v1991_v15 = vunpack.i.h.bf16 %v1989_v56  ;;  %v1990_v19 = vunpack.i.l.bf16 %v1989_v56 }
 0x22a   :  { %v1158_v7 = vpop.permute.xlu0 %1157 }
 0x22b   :  { %v1219_v59 = vmul.f32 %v1158_v7, %v3971_v3 }
 0x22d   :  { %v1315_v46 = vsel %vm253_vm1, %v1980_v16, %v1219_v59  ;;  %v1143_v40 = vpop.permute.xlu2 %1142 }
 0x22e   :  { %v1329_v13 = vpack.c.bf16 %v1316_v48, %v1315_v46  ;;  %v1216_v57 = vmul.f32 %v1143_v40, %v3974_v11 }
 0x230   :  { %1404 = vmatpush.bf16.msra.mxu1 %v1329_v13  ;;  %1937 = vmatpush.bf16.msra.mxu3 %v1329_v13  ;;  %v1312_v21 = vsel %vm253_vm1, %v1991_v15, %v1216_v57 }
 0x232   :  { %v1148_v47 = vpop.permute.xlu0 %1147 }
 0x233   :  { %v1217_v4 = vmul.f32 %v1148_v47, %v3973_v58 }
 0x235   :  { %v1313_v36 = vsel %vm253_vm1, %v1985_v60, %v1217_v4 }
 0x236   :  { %v1328_v52 = vpack.c.bf16 %v1314_v1, %v1313_v36 }
 0x238   :  { %1405 = vmatpush.bf16.msra.mxu1 %v1328_v52  ;;  %1938 = vmatpush.bf16.msra.mxu3 %v1328_v52 }
 0x23a   :  { %v1138_v25 = vpop.permute.xlu0 %1137 }
 0x23b   :  { %v1215_v30 = vmul.f32 %v1138_v25, %v3975_v8 }
 0x23d   :  { %v1311_v10 = vsel %vm253_vm1, %v1990_v19, %v1215_v30 }
 0x23e   :  { %v1327_v55 = vpack.c.bf16 %v1312_v21, %v1311_v10 }
 0x240   :  { %1406 = vmatpush.bf16.msra.mxu1 %v1327_v55  ;;  %1939 = vmatpush.bf16.msra.mxu3 %v1327_v55 }
 0x243   :  { %1407 = vmatmul.bf16.vlgmr.msra.gmra.mxu1 %v1916_v62  ;;  %1427 = vmatmul.bf16.vlgmr.msra.gmra.mxu3 %v1920_v28 }
 0x253   :  { %1412 = vmatmul.bf16.gmra.mxu1 %v1917_v54  ;;  %1432 = vmatmul.bf16.gmra.mxu3 %v1921_v32 }
 0x263   :  { %1417 = vmatmul.bf16.gmra.mxu1 %v1918_v49  ;;  %1437 = vmatmul.bf16.gmra.mxu3 %v1922_v29 }
 0x273   :  { %1422 = vmatmul.bf16.gmra.mxu1 %v1919_v33  ;;  %1442 = vmatmul.bf16.gmra.mxu3 %v1923_v20 }
 0x2c0   :  { %v3661_v38 = vpop.f32.mrf.mxu1 }
 0x2c1   :  { %v1448_v12 = vmul.f32 %v3661_v38, %v3661_v38 }
 0x2c3   :  { %v1464_v35 = vsub.f32 0.0, %v1448_v12 }
 0x2c5   :  { %v1480_v14 = vsel %vm253_vm1, %v1464_v35, %v1448_v12 }
 0x2c6   :  { %v3667_v2 = vpop.f32.mrf.mxu3  ;;  %1496 = vadd.xlane.f32.xlu0 %v1480_v14 }
 0x2c7   :  { %v1456_v45 = vmul.f32 %v3667_v2, %v3667_v2 }
 0x2c8   :  { %v3671_v42 = vpop.f32.mrf.mxu1 }
 0x2c9   :  { %v1472_v34 = vsub.f32 0.0, %v1456_v45  ;;  %v1449_v27 = vmul.f32 %v3671_v42, %v3671_v42 }
 0x2cb   :  { %v1465_v9 = vsub.f32 0.0, %v1449_v27  ;;  %v1488_v18 = vsel %vm253_vm1, %v1472_v34, %v1456_v45 }
 0x2cc   :  { %1512 = vadd.xlane.f32.xlu1 %v1488_v18 }
 0x2cd   :  { %v1481_v0 = vsel %vm253_vm1, %v1465_v9, %v1449_v27 }
 0x2ce   :  { %v3679_v53 = vpop.f32.mrf.mxu3  ;;  %1498 = vadd.xlane.f32.xlu2 %v1481_v0 }
 0x2cf   :  { %v1457_v44 = vmul.f32 %v3679_v53, %v3679_v53 }
 0x2d0   :  { %v3683_v37 = vpop.f32.mrf.mxu1 }
 0x2d1   :  { %v1473_v41 = vsub.f32 0.0, %v1457_v44  ;;  %v1450_v43 = vmul.f32 %v3683_v37, %v3683_v37 }
 0x2d3   :  { %v1466_v5 = vsub.f32 0.0, %v1450_v43  ;;  %v1489_v6 = vsel %vm253_vm1, %v1473_v41, %v1457_v44 }
 0x2d5   :  { %v1482_v50 = vsel %vm253_vm1, %v1466_v5, %v1450_v43 }
 0x2d6   :  { %v3691_v31 = vpop.f32.mrf.mxu3  ;;  %1514 = vadd.xlane.f32.xlu2 %v1489_v6  ;;  %1500 = vadd.xlane.f32.xlu1 %v1482_v50 }
 0x2d7   :  { %v1458_v22 = vmul.f32 %v3691_v31, %v3691_v31 }
 0x2d8   :  { %v3695_v63 = vpop.f32.mrf.mxu1 }
 0x2d9   :  { %v1474_v51 = vsub.f32 0.0, %v1458_v22  ;;  %v1451_v7 = vmul.f32 %v3695_v63, %v3695_v63 }
 0x2db   :  { %v1467_v16 = vsub.f32 0.0, %v1451_v7  ;;  %v1490_v3 = vsel %vm253_vm1, %v1474_v51, %v1458_v22 }
 0x2dc   :  { %1516 = vadd.xlane.f32.xlu0 %v1490_v3 }
 0x2dd   :  { %v1483_v59 = vsel %vm253_vm1, %v1467_v16, %v1451_v7 }
 0x2de   :  { %v3703_v24 = vpop.f32.mrf.mxu3  ;;  %1502 = vadd.xlane.f32.xlu2 %v1483_v59 }
 0x2df   :  { %v1459_v17 = vmul.f32 %v3703_v24, %v3703_v24 }
 0x2e0   :  { %v3707_v46 = vpop.f32.mrf.mxu1 }
 0x2e1   :  { %v1475_v48 = vsub.f32 0.0, %v1459_v17  ;;  %v1452_v13 = vmul.f32 %v3707_v46, %v3707_v46 }
 0x2e3   :  { %v1468_v39 = vsub.f32 0.0, %v1452_v13  ;;  %v1491_v61 = vsel %vm253_vm1, %v1475_v48, %v1459_v17 }
 0x2e4   :  { %1518 = vadd.xlane.f32.xlu1 %v1491_v61 }
 0x2e5   :  { %v1484_v26 = vsel %vm253_vm1, %v1468_v39, %v1452_v13 }
 0x2e6   :  { %v3715_v47 = vpop.f32.mrf.mxu3  ;;  %1504 = vadd.xlane.f32.xlu0 %v1484_v26 }
 0x2e7   :  { %v1460_v60 = vmul.f32 %v3715_v47, %v3715_v47 }
 0x2e8   :  { %v3719_v58 = vpop.f32.mrf.mxu1 }
 0x2e9   :  { %v1476_v4 = vsub.f32 0.0, %v1460_v60  ;;  %v1453_v36 = vmul.f32 %v3719_v58, %v3719_v58 }
 0x2eb   :  { %v1469_v1 = vsub.f32 0.0, %v1453_v36  ;;  %v1492_v40 = vsel %vm253_vm1, %v1476_v4, %v1460_v60 }
 0x2ec   :  { %1520 = vadd.xlane.f32.xlu2 %v1492_v40 }
 0x2ed   :  { %v1485_v56 = vsel %vm253_vm1, %v1469_v1, %v1453_v36 }
 0x2ee   :  { %v3727_v52 = vpop.f32.mrf.mxu3  ;;  %1506 = vadd.xlane.f32.xlu1 %v1485_v56 }
 0x2ef   :  { %v1461_v28 = vmul.f32 %v3727_v52, %v3727_v52 }
 0x2f0   :  { %v3729_v11 = vpop.f32.mrf.mxu1 }
 0x2f1   :  { %v1454_v57 = vmul.f32 %v3729_v11, %v3729_v11  ;;  %v1477_v29 = vsub.f32 0.0, %v1461_v28 }
 0x2f3   :  { %v1470_v15 = vsub.f32 0.0, %v1454_v57  ;;  %v1493_v12 = vsel %vm253_vm1, %v1477_v29, %v1461_v28 }
 0x2f5   :  { %v1486_v25 = vsel %vm253_vm1, %v1470_v15, %v1454_v57 }
 0x2f6   :  { %v3735_v19 = vpop.f32.mrf.mxu3  ;;  %1508 = vadd.xlane.f32.xlu2 %v1486_v25 }
 0x2f7   :  { %v1462_v8 = vmul.f32 %v3735_v19, %v3735_v19 }
 0x2f8   :  { %v3739_v30 = vpop.f32.mrf.mxu1 }
 0x2f9   :  { %v1478_v10 = vsub.f32 0.0, %v1462_v8  ;;  %v1455_v21 = vmul.f32 %v3739_v30, %v3739_v30 }
 0x2fb   :  { %v1471_v55 = vsub.f32 0.0, %v1455_v21  ;;  %v1494_v62 = vsel %vm253_vm1, %v1478_v10, %v1462_v8 }
 0x2fc   :  { %1524 = vadd.xlane.f32.xlu1 %v1494_v62 }
 0x2fd   :  { %v1487_v54 = vsel %vm253_vm1, %v1471_v55, %v1455_v21 }
 0x2fe   :  { %v3749_v32 = vpop.f32.mrf.mxu3  ;;  %1510 = vadd.xlane.f32.xlu0 %v1487_v54 }
 0x2ff   :  { %v1463_v49 = vmul.f32 %v3749_v32, %v3749_v32 }
 0x301   :  { %v1479_v33 = vsub.f32 0.0, %v1463_v49 }
 0x303   :  { %v1495_v20 = vsel %vm253_vm1, %v1479_v33, %v1463_v49 }
 0x304   :  { %1526 = vadd.xlane.f32.xlu2 %v1495_v20 }
 0x306   :  { %1522 = vadd.xlane.f32.xlu0 %v1493_v12 }
 0x339   :  { %v1497_v35 = vpop.xlane.xlu0 %1496 }
 0x33a   :  { %v1528_v14 = vand.u32 2147483647, %v1497_v35 }
 0x33c   :  { %v1544_v45 = vmax.f32 %v1528_v14, 1e-08 }
 0x33e   :  { %2121 = vrsqrt.f32 %v1544_v45  ;;  %vm1566_vm4 = vweird.f32 %v1544_v45 }
 0x33f   :  { %v1513_v34 = vpop.xlane.xlu1 %1512 }
 0x340   :  { %v1536_v27 = vand.u32 2147483647, %v1513_v34 }
 0x341   :  { %v1499_v9 = vpop.xlane.xlu2 %1498 }
 0x342   :  { %v1552_v18 = vmax.f32 %v1536_v27, 1e-08  ;;  %v1529_v0 = vand.u32 2147483647, %v1499_v9 }
 0x344   :  { %v2122_v44 = vpop.eup %2121  ;;  %2123 = vrsqrt.f32 %v1552_v18  ;;  %v1545_v41 = vmax.f32 %v1529_v0, 1e-08  ;;  %vm1646_vm5 = vweird.f32 %v1552_v18 }
 0x345   :  { %v1561_v43 = vmul.f32 %v2122_v44, %v1544_v45  ;;  %vm1567_vm2 = vweird.f32 %v2122_v44 }
 0x346   :  { %2125 = vrsqrt.f32 %v1545_v41  ;;  %vm1568_vm9 = vmor %vm1566_vm4, %vm1567_vm2  ;;  %vm1576_vm8 = vweird.f32 %v1545_v41 }
 0x347   :  { %v1562_v5 = vmul.f32 %v2122_v44, %v1561_v43 }
 0x349   :  { %v1563_v6 = vmul.f32 0.5, %v1562_v5  ;;  %v1515_v50 = vpop.xlane.xlu2 %1514  ;;  %v1501_v23 = vpop.xlane.xlu1 %1500 }
 0x34a   :  { %v2124_v22 = vpop.eup %2123  ;;  %v1537_v51 = vand.u32 2147483647, %v1515_v50  ;;  %v1530_v7 = vand.u32 2147483647, %v1501_v23 }
 0x34b   :  { %v1564_v16 = vsub.f32 1.5, %v1563_v6  ;;  %v1641_v3 = vmul.f32 %v2124_v22, %v1552_v18  ;;  %vm1647_vm3 = vweird.f32 %v2124_v22 }
 0x34c   :  { %v2126_v59 = vpop.eup %2125  ;;  %v3757_v17 = vmax.f32 %v1537_v51, 1e-08  ;;  %v3759_v48 = vmax.f32 %v1530_v7, 1e-08  ;;  %vm1648_vm7 = vmor %vm1646_vm5, %vm1647_vm3 }
 0x34d   :  { %v1565_v13 = vmul.f32 %v2122_v44, %v1564_v16  ;;  %v1642_v39 = vmul.f32 %v2124_v22, %v1641_v3  ;;  %v1571_v61 = vmul.f32 %v2126_v59, %v1545_v41  ;;  %vm1577_vm6 = vweird.f32 %v2126_v59 }
 0x34e   :  { %2127 = vrsqrt.f32 %v3757_v17  ;;  %vm1578_vm12 = vmor %vm1576_vm8, %vm1577_vm6  ;;  %vm1656_vm13 = vweird.f32 %v3757_v17  ;;  %vm1586_vm15 = vweird.f32 %v3759_v48 }
 0x34f   :  { %v1569_v26 = vsel %vm1568_vm9, %v2122_v44, %v1565_v13  ;;  %v1643_v60 = vmul.f32 0.5, %v1642_v39  ;;  %v1572_v4 = vmul.f32 %v2126_v59, %v1571_v61  ;;  %2129 = vrsqrt.f32 %v3759_v48  ;;  %v1517_v36 = vpop.xlane.xlu0 %1516 }
 0x350   :  { %v1720_v1 = vmul.f32 %v1569_v26, %v3661_v38  ;;  %v1538_v40 = vand.u32 2147483647, %v1517_v36 }
 0x351   :  { %v1644_v56 = vsub.f32 1.5, %v1643_v60  ;;  %v1573_v57 = vmul.f32 0.5, %v1572_v4  ;;  %v1503_v15 = vpop.xlane.xlu2 %1502 }
 0x352   :  { %1736 = vst [vmem:[#allocation9] sm:$0xff] %v1720_v1  ;;  %v3764_v25 = vmax.f32 %v1538_v40, 1e-08  ;;  %v1531_v8 = vand.u32 2147483647, %v1503_v15 }
 0x353   :  { %v1645_v10 = vmul.f32 %v2124_v22, %v1644_v56  ;;  %v1574_v21 = vsub.f32 1.5, %v1573_v57 }
 0x354   :  { %v2128_v55 = vpop.eup %2127  ;;  %2131 = vrsqrt.f32 %v3764_v25  ;;  %v3767_v62 = vmax.f32 %v1531_v8, 1e-08  ;;  %vm1666_vm2 = vweird.f32 %v3764_v25 }
 0x355   :  { %v2130_v38 = vpop.eup %2129  ;;  %v1649_v28 = vsel %vm1648_vm7, %v2124_v22, %v1645_v10  ;;  %v1575_v54 = vmul.f32 %v2126_v59, %v1574_v21  ;;  %v1651_v49 = vmul.f32 %v2128_v55, %v3757_v17  ;;  %vm1657_vm11 = vweird.f32 %v2128_v55 }
 0x356   :  { %v1728_v29 = vmul.f32 %v1649_v28, %v3667_v2  ;;  %v1581_v33 = vmul.f32 %v2130_v38, %v3759_v48  ;;  %2133 = vrsqrt.f32 %v3767_v62  ;;  %vm1587_vm10 = vweird.f32 %v2130_v38  ;;  %vm1658_vm14 = vmor %vm1656_vm13, %vm1657_vm11 }
 0x357   :  { %v1579_v20 = vsel %vm1578_vm12, %v2126_v59, %v1575_v54  ;;  %v1652_v12 = vmul.f32 %v2128_v55, %v1651_v49  ;;  %v1519_v35 = vpop.xlane.xlu1 %1518  ;;  %vm1588_vm0 = vmor %vm1586_vm15, %vm1587_vm10  ;;  %vm1596_vm3 = vweird.f32 %v3767_v62 }
 0x358   :  { %1744 = vst [vmem:[#allocation9 + $0x40] sm:$0xff] %v1728_v29  ;;  %v1721_v14 = vmul.f32 %v1579_v20, %v3671_v42  ;;  %v1582_v45 = vmul.f32 %v2130_v38, %v1581_v33  ;;  %v1539_v34 = vand.u32 2147483647, %v1519_v35 }
 0x359   :  { %v1653_v27 = vmul.f32 0.5, %v1652_v12  ;;  %v1505_v9 = vpop.xlane.xlu0 %1504 }
 0x35a   :  { %v2132_v18 = vpop.eup %2131  ;;  %1737 = vst [vmem:[#allocation9 + $0x8] sm:$0xff] %v1721_v14  ;;  %v1583_v0 = vmul.f32 0.5, %v1582_v45  ;;  %v3774_v44 = vmax.f32 %v1539_v34, 1e-08  ;;  %v1532_v2 = vand.u32 2147483647, %v1505_v9 }
 0x35b   :  { %v1654_v41 = vsub.f32 1.5, %v1653_v27  ;;  %v1661_v43 = vmul.f32 %v2132_v18, %v3764_v25  ;;  %vm1667_vm1 = vweird.f32 %v2132_v18 }
 0x35c   :  { %v2134_v5 = vpop.eup %2133  ;;  %v1584_v6 = vsub.f32 1.5, %v1583_v0  ;;  %2135 = vrsqrt.f32 %v3774_v44  ;;  %v3778_v42 = vmax.f32 %v1532_v2, 1e-08  ;;  %vm1668_vm9 = vmor %vm1666_vm2, %vm1667_vm1  ;;  %vm1676_vm7 = vweird.f32 %v3774_v44 }
 0x35d   :  { %v1655_v50 = vmul.f32 %v2128_v55, %v1654_v41  ;;  %v1662_v23 = vmul.f32 %v2132_v18, %v1661_v43  ;;  %v1591_v22 = vmul.f32 %v2134_v5, %v3767_v62  ;;  %vm1597_vm4 = vweird.f32 %v2134_v5 }
 0x35e   :  { %v1585_v51 = vmul.f32 %v2130_v38, %v1584_v6  ;;  %2137 = vrsqrt.f32 %v3778_v42  ;;  %vm1598_vm5 = vmor %vm1596_vm3, %vm1597_vm4  ;;  %vm1606_vm11 = vweird.f32 %v3778_v42 }
 0x35f   :  { %v1659_v7 = vsel %vm1658_vm14, %v2128_v55, %v1655_v50  ;;  %v1663_v16 = vmul.f32 0.5, %v1662_v23  ;;  %v1592_v3 = vmul.f32 %v2134_v5, %v1591_v22  ;;  %v1521_v59 = vpop.xlane.xlu2 %1520 }
 0x360   :  { %v1729_v13 = vmul.f32 %v1659_v7, %v3679_v53  ;;  %v1589_v39 = vsel %vm1588_vm0, %v2130_v38, %v1585_v51  ;;  %v1540_v61 = vand.u32 2147483647, %v1521_v59 }
 0x361   :  { %v1722_v17 = vmul.f32 %v1589_v39, %v3683_v37  ;;  %v1664_v26 = vsub.f32 1.5, %v1663_v16  ;;  %v1593_v60 = vmul.f32 0.5, %v1592_v3  ;;  %v1507_v4 = vpop.xlane.xlu1 %1506 }
 0x362   :  { %v2136_v36 = vpop.eup %2135  ;;  %1745 = vst [vmem:[#allocation9 + $0x48] sm:$0xff] %v1729_v13  ;;  %v3787_v48 = vmax.f32 %v1540_v61, 1e-08  ;;  %v1533_v1 = vand.u32 2147483647, %v1507_v4 }
 0x363   :  { %1738 = vst [vmem:[#allocation9 + $0x10] sm:$0xff] %v1722_v17  ;;  %v1665_v40 = vmul.f32 %v2132_v18, %v1664_v26  ;;  %v1594_v56 = vsub.f32 1.5, %v1593_v60  ;;  %v1671_v53 = vmul.f32 %v2136_v36, %v3774_v44  ;;  %vm1677_vm6 = vweird.f32 %v2136_v36 }
 0x364   :  { %v2138_v57 = vpop.eup %2137  ;;  %2139 = vrsqrt.f32 %v3787_v48  ;;  %v3792_v37 = vmax.f32 %v1533_v1, 1e-08  ;;  %vm1678_vm12 = vmor %vm1676_vm7, %vm1677_vm6  ;;  %vm1686_vm14 = vweird.f32 %v3787_v48 }
 0x365   :  { %v1669_v15 = vsel %vm1668_vm9, %v2132_v18, %v1665_v40  ;;  %v1595_v8 = vmul.f32 %v2134_v5, %v1594_v56  ;;  %v1672_v25 = vmul.f32 %v2136_v36, %v1671_v53  ;;  %v1601_v10 = vmul.f32 %v2138_v57, %v3778_v42 }
 0x366   :  { %v1730_v21 = vmul.f32 %v1669_v15, %v3691_v31  ;;  %2141 = vrsqrt.f32 %v3792_v37  ;;  %vm1607_vm8 = vweird.f32 %v2138_v57  ;;  %vm1616_vm1 = vweird.f32 %v3792_v37 }
 0x367   :  { %v1599_v55 = vsel %vm1598_vm5, %v2134_v5, %v1595_v8  ;;  %v1673_v38 = vmul.f32 0.5, %v1672_v25  ;;  %v1602_v28 = vmul.f32 %v2138_v57, %v1601_v10  ;;  %vm1608_vm10 = vmor %vm1606_vm11, %vm1607_vm8 }
 0x368   :  { %1746 = vst [vmem:[#allocation9 + $0x50] sm:$0xff] %v1730_v21  ;;  %v1723_v62 = vmul.f32 %v1599_v55, %v3695_v63 }
 0x369   :  { %v1674_v54 = vsub.f32 1.5, %v1673_v38  ;;  %v1603_v49 = vmul.f32 0.5, %v1602_v28  ;;  %v1509_v29 = vpop.xlane.xlu2 %1508 }
 0x36a   :  { %v2140_v33 = vpop.eup %2139  ;;  %1739 = vst [vmem:[#allocation9 + $0x18] sm:$0xff] %v1723_v62  ;;  %v1534_v20 = vand.u32 2147483647, %v1509_v29 }
 0x36b   :  { %v1675_v12 = vmul.f32 %v2136_v36, %v1674_v54  ;;  %v1604_v31 = vsub.f32 1.5, %v1603_v49  ;;  %v1681_v35 = vmul.f32 %v2140_v33, %v3787_v48  ;;  %vm1687_vm13 = vweird.f32 %v2140_v33 }
 0x36c   :  { %v2142_v14 = vpop.eup %2141  ;;  %v1550_v45 = vmax.f32 %v1534_v20, 1e-08  ;;  %vm1688_vm0 = vmor %vm1686_vm14, %vm1687_vm13 }
 0x36d   :  { %v1679_v63 = vsel %vm1678_vm12, %v2136_v36, %v1675_v12  ;;  %v1605_v34 = vmul.f32 %v2138_v57, %v1604_v31  ;;  %v1682_v27 = vmul.f32 %v2140_v33, %v1681_v35  ;;  %v1611_v9 = vmul.f32 %v2142_v14, %v3792_v37 }
 0x36e   :  { %v1731_v18 = vmul.f32 %v1679_v63, %v3703_v24  ;;  %2143 = vrsqrt.f32 %v1550_v45  ;;  %vm1617_vm15 = vweird.f32 %v2142_v14  ;;  %vm1626_vm9 = vweird.f32 %v1550_v45 }
 0x36f   :  { %v1609_v0 = vsel %vm1608_vm10, %v2138_v57, %v1605_v34  ;;  %v1683_v44 = vmul.f32 0.5, %v1682_v27  ;;  %v1612_v2 = vmul.f32 %v2142_v14, %v1611_v9  ;;  %v1525_v41 = vpop.xlane.xlu1 %1524  ;;  %vm1618_vm2 = vmor %vm1616_vm1, %vm1617_vm15 }
 0x370   :  { %1747 = vst [vmem:[#allocation9 + $0x58] sm:$0xff] %v1731_v18  ;;  %v1724_v43 = vmul.f32 %v1609_v0, %v3707_v46  ;;  %v1542_v5 = vand.u32 2147483647, %v1525_v41 }
 0x371   :  { %v1684_v6 = vsub.f32 1.5, %v1683_v44  ;;  %v1613_v42 = vmul.f32 0.5, %v1612_v2  ;;  %v1511_v50 = vpop.xlane.xlu0 %1510 }
 0x372   :  { %1740 = vst [vmem:[#allocation9 + $0x20] sm:$0xff] %v1724_v43  ;;  %v1558_v23 = vmax.f32 %v1542_v5, 1e-08  ;;  %v1535_v22 = vand.u32 2147483647, %v1511_v50 }
 0x373   :  { %v1685_v51 = vmul.f32 %v2140_v33, %v1684_v6  ;;  %v1614_v24 = vsub.f32 1.5, %v1613_v42 }
 0x374   :  { %v2144_v7 = vpop.eup %2143  ;;  %2145 = vrsqrt.f32 %v1558_v23  ;;  %v1551_v16 = vmax.f32 %v1535_v22, 1e-08  ;;  %vm1706_vm6 = vweird.f32 %v1558_v23 }
 0x375   :  { %v1689_v3 = vsel %vm1688_vm0, %v2140_v33, %v1685_v51  ;;  %v1615_v59 = vmul.f32 %v2142_v14, %v1614_v24  ;;  %v1621_v46 = vmul.f32 %v2144_v7, %v1550_v45  ;;  %vm1627_vm4 = vweird.f32 %v2144_v7 }
 0x376   :  { %v1732_v13 = vmul.f32 %v1689_v3, %v3715_v47  ;;  %2147 = vrsqrt.f32 %v1551_v16  ;;  %vm1628_vm3 = vmor %vm1626_vm9, %vm1627_vm4  ;;  %vm1636_vm12 = vweird.f32 %v1551_v16 }
 0x377   :  { %v1619_v39 = vsel %vm1618_vm2, %v2142_v14, %v1615_v59  ;;  %v1622_v61 = vmul.f32 %v2144_v7, %v1621_v46  ;;  %v1527_v17 = vpop.xlane.xlu2 %1526 }
 0x378   :  { %1748 = vst [vmem:[#allocation9 + $0x60] sm:$0xff] %v1732_v13  ;;  %v1725_v26 = vmul.f32 %v1619_v39, %v3719_v58  ;;  %v1543_v60 = vand.u32 2147483647, %v1527_v17 }
 0x379   :  { %v1623_v4 = vmul.f32 0.5, %v1622_v61  ;;  %v1523_v36 = vpop.xlane.xlu0 %1522 }
 0x37a   :  { %v2146_v48 = vpop.eup %2145  ;;  %1741 = vst [vmem:[#allocation9 + $0x28] sm:$0xff] %v1725_v26  ;;  %v1559_v1 = vmax.f32 %v1543_v60, 1e-08  ;;  %v1541_v40 = vand.u32 2147483647, %v1523_v36 }
 0x37b   :  { %v1624_v56 = vsub.f32 1.5, %v1623_v4  ;;  %v1701_v53 = vmul.f32 %v2146_v48, %v1558_v23  ;;  %vm1707_vm5 = vweird.f32 %v2146_v48 }
 0x37c   :  { %v2148_v57 = vpop.eup %2147  ;;  %2149 = vrsqrt.f32 %v1559_v1  ;;  %v1557_v47 = vmax.f32 %v1541_v40, 1e-08  ;;  %vm1708_vm8 = vmor %vm1706_vm6, %vm1707_vm5  ;;  %vm1716_vm13 = vweird.f32 %v1559_v1 }
 0x37d   :  { %v1625_v37 = vmul.f32 %v2144_v7, %v1624_v56  ;;  %v1702_v15 = vmul.f32 %v2146_v48, %v1701_v53  ;;  %v1631_v8 = vmul.f32 %v2148_v57, %v1551_v16  ;;  %vm1637_vm7 = vweird.f32 %v2148_v57 }
 0x37e   :  { %2151 = vrsqrt.f32 %v1557_v47  ;;  %vm1638_vm11 = vmor %vm1636_vm12, %vm1637_vm7  ;;  %vm1696_vm0 = vweird.f32 %v1557_v47 }
 0x37f   :  { %v1629_v58 = vsel %vm1628_vm3, %v2144_v7, %v1625_v37  ;;  %v1703_v25 = vmul.f32 0.5, %v1702_v15  ;;  %v1632_v10 = vmul.f32 %v2148_v57, %v1631_v8 }
 0x380   :  { %v1726_v21 = vmul.f32 %v1629_v58, %v3729_v11 }
 0x381   :  { %v1704_v55 = vsub.f32 1.5, %v1703_v25  ;;  %v1633_v38 = vmul.f32 0.5, %v1632_v10 }
 0x382   :  { %v2150_v28 = vpop.eup %2149  ;;  %1742 = vst [vmem:[#allocation9 + $0x30] sm:$0xff] %v1726_v21 }
 0x383   :  { %v1705_v62 = vmul.f32 %v2146_v48, %v1704_v55  ;;  %v1634_v54 = vsub.f32 1.5, %v1633_v38  ;;  %v1711_v49 = vmul.f32 %v2150_v28, %v1559_v1  ;;  %vm1717_vm10 = vweird.f32 %v2150_v28 }
 0x384   :  { %v2152_v29 = vpop.eup %2151  ;;  %vm1718_vm15 = vmor %vm1716_vm13, %vm1717_vm10 }
 0x385   :  { %v1709_v33 = vsel %vm1708_vm8, %v2146_v48, %v1705_v62  ;;  %v1635_v20 = vmul.f32 %v2148_v57, %v1634_v54  ;;  %v1712_v12 = vmul.f32 %v2150_v28, %v1711_v49  ;;  %v1691_v31 = vmul.f32 %v2152_v29, %v1557_v47 }
 0x386   :  { %v1734_v35 = vmul.f32 %v1709_v33, %v3735_v19  ;;  %vm1697_vm14 = vweird.f32 %v2152_v29 }
 0x387   :  { %v1639_v11 = vsel %vm1638_vm11, %v2148_v57, %v1635_v20  ;;  %v1713_v14 = vmul.f32 0.5, %v1712_v12  ;;  %v1692_v45 = vmul.f32 %v2152_v29, %v1691_v31  ;;  %vm1698_vm1 = vmor %vm1696_vm0, %vm1697_vm14 }
 0x388   :  { %1750 = vst [vmem:[#allocation9 + $0x70] sm:$0xff] %v1734_v35  ;;  %v1727_v63 = vmul.f32 %v1639_v11, %v3739_v30 }
 0x389   :  { %v1714_v34 = vsub.f32 1.5, %v1713_v14  ;;  %v1693_v27 = vmul.f32 0.5, %v1692_v45 }
 0x38a   :  { %1743 = vst [vmem:[#allocation9 + $0x38] sm:$0xff] %v1727_v63 }
 0x38b   :  { %v1715_v9 = vmul.f32 %v2150_v28, %v1714_v34  ;;  %v1694_v18 = vsub.f32 1.5, %v1693_v27 }
 0x38d   :  { %v1719_v19 = vsel %vm1718_vm15, %v2150_v28, %v1715_v9  ;;  %v1695_v0 = vmul.f32 %v2152_v29, %v1694_v18 }
 0x38e   :  { %v1735_v30 = vmul.f32 %v1719_v19, %v3749_v32 }
 0x38f   :  { %v1699_v44 = vsel %vm1698_vm1, %v2152_v29, %v1695_v0 }
 0x390   :  { %1751 = vst [vmem:[#allocation9 + $0x78] sm:$0xff] %v1735_v30  ;;  %v1733_v2 = vmul.f32 %v1699_v44, %v3727_v52 }
 0x392   :  { %1749 = vst [vmem:[#allocation9 + $0x68] sm:$0xff] %v1733_v2 }
 0x393   :  { %1764 = dma.vmem_to_hbm [thread:$0]  %s1757_s10, 2048, %s1759_s13, [#allocation5], %s2262_s14, %s2262_s14, %s2263_s15  }
 0x394   :  { %2253 = dma.done.wait [#allocation5], 2048  }
 0x395   :  { %2254 = vsyncadd [#allocation5], 4294965248 }
 0x396   :  { %1769 = vsyncpa [#allocation4], 1 }
 0x397   :  { %1770 = vsyncpa [#allocation7], 1 }
 0x398   :  { %1771 = vsyncpa [#allocation5], 1 }

</bundles_post_ra>
